<compile_context>
chip_gen: v7x
topology: tpu7x:2x2x1
jax: 0.10.0
libtpu: 0.0.40
codegen_flags: <defaults>
</compile_context>

<pallas_src>
import functools
import math

import jax
import jax.numpy as jnp
from jax.experimental import pallas as pl
from jax.experimental.pallas import tpu as pltpu


# ----------------------------------------------------------------------------
# TPU-generation helpers (VMEM budgets & tile preferences)
# ----------------------------------------------------------------------------
def _device_kind() -> str:
    try:
        return jax.devices()[0].device_kind.lower()
    except Exception:
        return ""


def _is_v7() -> bool:
    return "v7" in _device_kind()


def _vmem_budget_bytes() -> int:
    # Scoped-VMEM limit requested for the streaming output layer.
    #   v5e/v6e: 128 MiB physical (16/32 MiB default scoped) -> 72 MiB is safe.
    #   v7x:      64 MiB physical                            -> 40 MiB, headroom.
    return (40 << 20) if _is_v7() else (72 << 20)


def _tile_prefs():
    # Cap tn at 4096 on v7x (half the VMEM of v5e/v6e); allow 8192 elsewhere.
    if _is_v7():
        return (4096, 2048, 1024, 512, 256, 128)
    return (8192, 4096, 2048, 1024, 512, 256, 128)


def _round_up(x: int, m: int) -> int:
    return ((x + m - 1) // m) * m


# ----------------------------------------------------------------------------
# Kernel 1: fused hidden network (layers 1-4), fully VMEM-resident, grid=(1,)
# ----------------------------------------------------------------------------
def _hidden_net_kernel(z_ref,
                       w1_ref, b1_ref,
                       w2_ref, g2_ref, be2_ref,
                       w3_ref, g3_ref, be3_ref,
                       w4_ref, g4_ref, be4_ref,
                       o_ref, *, eps, slope):
    def lrelu(y):
        return jnp.where(y > 0, y, slope * y)

    def bn_lrelu(y, g, be):
        # Training-mode BatchNorm1d: batch mean, biased variance, eps=0.8.
        mean = jnp.mean(y, axis=0, keepdims=True)
        c = y - mean
        var = jnp.mean(c * c, axis=0, keepdims=True)
        y = c * jax.lax.rsqrt(var + eps) * g + be
        return lrelu(y)

    # Layer 1: Linear + bias + LeakyReLU (no BN -> bias kept).
    y = jnp.dot(z_ref[...].astype(jnp.bfloat16), w1_ref[...],
                preferred_element_type=jnp.float32)
    y = lrelu(y + b1_ref[...])

    # Layer 2: Linear (bias cancels under BN) + BN + LeakyReLU.
    y = jnp.dot(y.astype(jnp.bfloat16), w2_ref[...],
                preferred_element_type=jnp.float32)
    y = bn_lrelu(y, g2_ref[...], be2_ref[...])

    # Layer 3.
    y = jnp.dot(y.astype(jnp.bfloat16), w3_ref[...],
                preferred_element_type=jnp.float32)
    y = bn_lrelu(y, g3_ref[...], be3_ref[...])

    # Layer 4.
    y = jnp.dot(y.astype(jnp.bfloat16), w4_ref[...],
                preferred_element_type=jnp.float32)
    y = bn_lrelu(y, g4_ref[...], be4_ref[...])

    # bf16 store: this activation only feeds the bf16 matmul of the final
    # layer, so the cast is free and halves the HBM activation round trip.
    o_ref[...] = y.astype(o_ref.dtype)


def fused_hidden_net(z, p1, p2, p3, p4, *, eps=0.8, slope=0.2):
    """Layers 1-4 in one VMEM-resident Pallas kernel. Returns (B, 1024) bf16."""
    B, _ = z.shape
    n_out = p4["w"].shape[1]

    operands = [
        z,
        p1["w"], p1["b"].reshape(1, -1),
        p2["w"], p2["gamma"].reshape(1, -1), p2["beta"].reshape(1, -1),
        p3["w"], p3["gamma"].reshape(1, -1), p3["beta"].reshape(1, -1),
        p4["w"], p4["gamma"].reshape(1, -1), p4["beta"].reshape(1, -1),
    ]
    # Everything is small (total <~3 MiB): single grid step, full blocks.
    in_specs = [pl.BlockSpec(op.shape, lambda i: (0, 0)) for op in operands]

    kern = functools.partial(_hidden_net_kernel,
                             eps=float(eps), slope=float(slope))
    return pl.pallas_call(
        kern,
        out_shape=jax.ShapeDtypeStruct((B, n_out), jnp.bfloat16),
        grid_spec=pltpu.PrefetchScalarGridSpec(
            num_scalar_prefetch=0,
            grid=(1,),
            in_specs=in_specs,
            out_specs=pl.BlockSpec((B, n_out), lambda i: (0, 0)),
        ),
        compiler_params=pltpu.CompilerParams(
            dimension_semantics=("arbitrary",)),
    )(*operands)


# ----------------------------------------------------------------------------
# Kernel 2: output layer Linear(1024 -> prod(img_shape)) + Tanh, tiled over N
# ----------------------------------------------------------------------------
def _output_layer_kernel(x_ref, w_ref, b_ref, o_ref):
    # x_ref: (B, K) bf16 (constant block index -> resident, not re-fetched)
    # w_ref: (K, TN) bf16 weight tile   b_ref: (1, TN) f32   o_ref: (B, TN)
    y = jnp.dot(x_ref[...], w_ref[...], preferred_element_type=jnp.float32)
    o_ref[...] = jnp.tanh(y + b_ref[...]).astype(o_ref.dtype)


def _choose_output_tiling(B, K, N, out_itemsize):
    """Pick (tn, padded_N, n_weight_buffers) under the per-generation budget."""
    budget = _vmem_budget_bytes() - (2 << 20)  # small margin for misc scratch

    def fits(tn, n_w_buf):
        wbytes = n_w_buf * 2 * K * tn            # bf16 weight buffers
        obytes = 2 * B * tn * out_itemsize       # output double buffer
        bbytes = 2 * 4 * tn                      # f32 bias double buffer
        xbytes = 2 * B * K * 2                   # resident bf16 activations
        return wbytes + obytes + bbytes + xbytes <= budget

    prefs = [t for t in _tile_prefs() if fits(t, 2)]
    if not prefs:
        prefs = [128]

    tn = None
    for t in prefs:                 # exact divisor first -> no padding
        if N % t == 0:
            tn = t
            break
    if tn is None:                  # otherwise pad N up to a tile multiple
        cap = _round_up(N, 128)
        tn = next((t for t in prefs if t <= cap), prefs[-1])
    n_pad = _round_up(N, tn)
    n_steps = n_pad // tn
    n_w_buf = 3 if (n_steps > 2 and fits(tn, 3)) else 2
    return tn, n_pad, n_w_buf


def output_layer(h, w, b, *, out_dtype=jnp.bfloat16):
    """out = tanh(h @ w + b); weight streamed from HBM in lane-dense tiles."""
    B, K = h.shape
    K2, N = w.shape
    assert K == K2, (h.shape, w.shape)
    out_itemsize = jnp.dtype(out_dtype).itemsize
    tn, n_pad, n_w_buf = _choose_output_tiling(B, K, N, out_itemsize)

    if n_pad != N:  # pad weight/bias columns; padded outputs are sliced off
        w = jnp.pad(w, ((0, 0), (0, n_pad - N)))
        b = jnp.pad(b, (0, n_pad - N))
    b2 = b.reshape(1, n_pad).astype(jnp.float32)

    grid = (n_pad // tn,)
    vmem_limit = _vmem_budget_bytes()
    cost = pl.CostEstimate(
        flops=2 * B * K * n_pad,
        transcendentals=B * n_pad,
        bytes_accessed=(2 * K * n_pad + 4 * n_pad + 2 * B * K
                        + out_itemsize * B * n_pad),
    )

    def run(use_deep_pipeline, semantics):
        if use_deep_pipeline:
            w_spec = pl.BlockSpec((K, tn), lambda j: (0, j),
                                  pipeline_mode=pl.Buffered(n_w_buf))
        else:
            w_spec = pl.BlockSpec((K, tn), lambda j: (0, j))
        call = pl.pallas_call(
            _output_layer_kernel,
            out_shape=jax.ShapeDtypeStruct((B, n_pad), out_dtype),
            grid_spec=pltpu.PrefetchScalarGridSpec(
                num_scalar_prefetch=0,
                grid=grid,
                in_specs=[
                    pl.BlockSpec((B, K), lambda j: (0, 0)),   # acts, resident
                    w_spec,                                   # bf16 weight tile
                    pl.BlockSpec((1, tn), lambda j: (0, j)),  # bias tile
                ],
                out_specs=pl.BlockSpec((B, tn), lambda j: (0, j)),
            ),
            compiler_params=pltpu.CompilerParams(
                dimension_semantics=(semantics,),
                vmem_limit_bytes=vmem_limit),
            cost_estimate=cost,
        )
        return call(h, w, b2)

    # Aggressive config: deeper weight pipeline; on v7x (the only 2-TC chip)
    # ask for core-parallel sharding of the N-tile grid.  Fall back to a
    # conservative config if the current jax/libtpu rejects either knob.
    semantics = (pltpu.CORE_PARALLEL
                 if (_is_v7() and grid[0] >= 2) else "parallel")
    try:
        out = run(n_w_buf >= 3, semantics)
    except Exception:
        out = run(False, "parallel")

    if n_pad != N:
        out = out[:, :N]
    return out


# ----------------------------------------------------------------------------
# Parameters (PyTorch-Linear-style uniform init; weights stored in bf16)
# ----------------------------------------------------------------------------
def init_generator_params(key, latent_dim, img_shape):
    out_dim = int(math.prod(img_shape))
    latent_pad = _round_up(latent_dim, 128)  # native minor dim for matmul #1
    layer_defs = [
        # (fan_in, padded_in, fan_out, use_bn, act)
        (latent_dim, latent_pad, 128,     False, "leaky_relu"),
        (128,        128,        256,     True,  "leaky_relu"),
        (256,        256,        512,     True,  "leaky_relu"),
        (512,        512,        1024,    True,  "leaky_relu"),
        (1024,       1024,       out_dim, False, "tanh"),
    ]
    params = []
    for fan_in, in_pad, fan_out, use_bn, act in layer_defs:
        key, kw, kb = jax.random.split(key, 3)
        bound = 1.0 / math.sqrt(fan_in)
        w = jax.random.uniform(kw, (fan_in, fan_out), jnp.float32,
                               minval=-bound, maxval=bound)
        if in_pad != fan_in:
            # zero rows: padded z columns contribute exactly zero
            w = jnp.pad(w, ((0, in_pad - fan_in), (0, 0)))
        w = w.astype(jnp.bfloat16)
        b = jax.random.uniform(kb, (fan_out,), jnp.float32,
                               minval=-bound, maxval=bound)
        gamma = jnp.ones((fan_out,), jnp.float32)
        beta = jnp.zeros((fan_out,), jnp.float32)
        params.append(dict(w=w, b=b, gamma=gamma, beta=beta,
                           use_bn=use_bn, act=act))
    return params


# ----------------------------------------------------------------------------
# Generator forward (Pallas) and a pure-JAX reference (same bf16 math)
# ----------------------------------------------------------------------------
def generator_forward(z, params, img_shape, *, out_dtype=jnp.bfloat16):
    p1, p2, p3, p4, p5 = params
    latent_pad = p1["w"].shape[0]
    if z.shape[1] != latent_pad:
        z = jnp.pad(z, ((0, 0), (0, latent_pad - z.shape[1])))
    h = fused_hidden_net(z, p1, p2, p3, p4)
    img = output_layer(h, p5["w"], p5["b"], out_dtype=out_dtype)
    return img.reshape((z.shape[0],) + tuple(img_shape))


def generator_reference(z, params, img_shape, eps=0.8, slope=0.2):
    latent_pad = params[0]["w"].shape[0]
    x = jnp.pad(z, ((0, 0), (0, latent_pad - z.shape[1])))
    for p in params:
        y = jnp.dot(x.astype(jnp.bfloat16), p["w"],
                    preferred_element_type=jnp.float32)
        if p["use_bn"]:
            # Linear bias before BatchNorm cancels exactly; omitted here too.
            mean = jnp.mean(y, axis=0, keepdims=True)
            var = jnp.mean((y - mean) ** 2, axis=0, keepdims=True)
            y = (y - mean) / jnp.sqrt(var + eps) * p["gamma"] + p["beta"]
        else:
            y = y + p["b"]
        if p["act"] == "leaky_relu":
            y = jnp.where(y > 0, y, slope * y)
        else:
            y = jnp.tanh(y)
        x = y
    return x.reshape((z.shape[0],) + tuple(img_shape))


if __name__ == "__main__":
    key = jax.random.PRNGKey(0)
    batch_size = 16
    latent_dim = 100

    key, kz = jax.random.split(key)
    z = jax.random.normal(kz, (batch_size, latent_dim), dtype=jnp.float32)

    # Case 1: tile-divisible output size (scaled down from (3, 256, 256)).
    # Case 2: awkward output size to exercise the pad-and-slice path.
    for img_shape in [(3, 32, 32), (3, 25, 25)]:
        key, kp = jax.random.split(key)
        params = init_generator_params(kp, latent_dim, img_shape)

        img = jax.block_until_ready(generator_forward(z, params, img_shape))
        assert img.shape == (batch_size,) + img_shape, img.shape

        ref = jax.block_until_ready(generator_reference(z, params, img_shape))
        max_err = float(jnp.max(jnp.abs(img.astype(jnp.float32) - ref)))
        assert max_err < 2e-2, (img_shape, max_err)

    print("KERNEL_OK")
</pallas_src>

<mosaic_0001>
module attributes {stable_mosaic.version = 11 : i64} {
  func.func @_hidden_net_kernel(%arg0: i32, %arg1: memref<16x128xf32, #tpu.memory_space<vmem>>, %arg2: memref<128x128xbf16, #tpu.memory_space<vmem>>, %arg3: memref<1x128xf32, #tpu.memory_space<vmem>>, %arg4: memref<128x256xbf16, #tpu.memory_space<vmem>>, %arg5: memref<1x256xf32, #tpu.memory_space<vmem>>, %arg6: memref<1x256xf32, #tpu.memory_space<vmem>>, %arg7: memref<256x512xbf16, #tpu.memory_space<vmem>>, %arg8: memref<1x512xf32, #tpu.memory_space<vmem>>, %arg9: memref<1x512xf32, #tpu.memory_space<vmem>>, %arg10: memref<512x1024xbf16, #tpu.memory_space<vmem>>, %arg11: memref<1x1024xf32, #tpu.memory_space<vmem>>, %arg12: memref<1x1024xf32, #tpu.memory_space<vmem>>, %arg13: memref<16x1024xbf16, #tpu.memory_space<vmem>>) attributes {dimension_semantics = [#tpu.dimension_semantics<arbitrary>], iteration_bounds = array<i64: 1>, scalar_prefetch = 0 : i64, scratch_operands = 0 : i64, tpu.core_type = #tpu.core_type<tc>, window_params = [{pipeline_mode = #tpu.pipeline_mode<synchronous>, transform_indices = @transform_0, window_bounds = array<i64: 16, 128>}, {pipeline_mode = #tpu.pipeline_mode<synchronous>, transform_indices = @transform_1, window_bounds = array<i64: 128, 128>}, {pipeline_mode = #tpu.pipeline_mode<synchronous>, transform_indices = @transform_2, window_bounds = array<i64: 1, 128>}, {pipeline_mode = #tpu.pipeline_mode<synchronous>, transform_indices = @transform_3, window_bounds = array<i64: 128, 256>}, {pipeline_mode = #tpu.pipeline_mode<synchronous>, transform_indices = @transform_4, window_bounds = array<i64: 1, 256>}, {pipeline_mode = #tpu.pipeline_mode<synchronous>, transform_indices = @transform_5, window_bounds = array<i64: 1, 256>}, {pipeline_mode = #tpu.pipeline_mode<synchronous>, transform_indices = @transform_6, window_bounds = array<i64: 256, 512>}, {pipeline_mode = #tpu.pipeline_mode<synchronous>, transform_indices = @transform_7, window_bounds = array<i64: 1, 512>}, {pipeline_mode = #tpu.pipeline_mode<synchronous>, transform_indices = @transform_8, window_bounds = array<i64: 1, 512>}, {pipeline_mode = #tpu.pipeline_mode<synchronous>, transform_indices = @transform_9, window_bounds = array<i64: 512, 1024>}, {pipeline_mode = #tpu.pipeline_mode<synchronous>, transform_indices = @transform_10, window_bounds = array<i64: 1, 1024>}, {pipeline_mode = #tpu.pipeline_mode<synchronous>, transform_indices = @transform_11, window_bounds = array<i64: 1, 1024>}, {pipeline_mode = #tpu.pipeline_mode<synchronous>, transform_indices = @transform_12, window_bounds = array<i64: 16, 1024>}]} {
    %c0 = arith.constant 0 : index
    %c0_0 = arith.constant 0 : index
    %0 = vector.load %arg1[%c0, %c0_0] : memref<16x128xf32, #tpu.memory_space<vmem>>, vector<16x128xf32>
    %1 = arith.truncf %0 : vector<16x128xf32> to vector<16x128xbf16>
    %c0_1 = arith.constant 0 : index
    %c0_2 = arith.constant 0 : index
    %2 = vector.load %arg2[%c0_1, %c0_2] : memref<128x128xbf16, #tpu.memory_space<vmem>>, vector<128x128xbf16>
    %cst = arith.constant dense<0.000000e+00> : vector<16x128xf32>
    %3 = tpu.matmul %1, %2, %cst {dimension_numbers = #tpu.dot_dimension_numbers<[1], [0], [0], [1], [0, 0, 1, 1], [], []>} : vector<16x128xbf16>, vector<128x128xbf16>, vector<16x128xf32> -> vector<16x128xf32>
    %c0_3 = arith.constant 0 : index
    %c0_4 = arith.constant 0 : index
    %4 = vector.load %arg3[%c0_3, %c0_4] : memref<1x128xf32, #tpu.memory_space<vmem>>, vector<1x128xf32>
    %5 = vector.broadcast %4 : vector<1x128xf32> to vector<16x128xf32>
    %6 = arith.addf %3, %5 : vector<16x128xf32>
    %cst_5 = arith.constant 0.000000e+00 : f32
    %7 = vector.broadcast %cst_5 : f32 to vector<16x128xf32>
    %8 = arith.cmpf ogt, %6, %7 : vector<16x128xf32>
    %cst_6 = arith.constant 2.000000e-01 : f32
    %9 = vector.broadcast %cst_6 : f32 to vector<16x128xf32>
    %10 = arith.mulf %9, %6 : vector<16x128xf32>
    %11 = arith.select %8, %6, %10 : vector<16x128xi1>, vector<16x128xf32>
    %12 = arith.truncf %11 : vector<16x128xf32> to vector<16x128xbf16>
    %c0_7 = arith.constant 0 : index
    %c0_8 = arith.constant 0 : index
    %13 = vector.load %arg4[%c0_7, %c0_8] : memref<128x256xbf16, #tpu.memory_space<vmem>>, vector<128x256xbf16>
    %cst_9 = arith.constant dense<0.000000e+00> : vector<16x256xf32>
    %14 = tpu.matmul %12, %13, %cst_9 {dimension_numbers = #tpu.dot_dimension_numbers<[1], [0], [0], [1], [0, 0, 1, 1], [], []>} : vector<16x128xbf16>, vector<128x256xbf16>, vector<16x256xf32> -> vector<16x256xf32>
    %c0_10 = arith.constant 0 : index
    %c0_11 = arith.constant 0 : index
    %15 = vector.load %arg5[%c0_10, %c0_11] : memref<1x256xf32, #tpu.memory_space<vmem>>, vector<1x256xf32>
    %c0_12 = arith.constant 0 : index
    %c0_13 = arith.constant 0 : index
    %16 = vector.load %arg6[%c0_12, %c0_13] : memref<1x256xf32, #tpu.memory_space<vmem>>, vector<1x256xf32>
    %cst_14 = arith.constant dense<0.000000e+00> : vector<256xf32>
    %17 = vector.multi_reduction <add>, %14, %cst_14 [0] : vector<16x256xf32> to vector<256xf32>
    %18 = vector.shape_cast %17 : vector<256xf32> to vector<1x256xf32>
    %cst_15 = arith.constant 1.600000e+01 : f32
    %19 = vector.broadcast %cst_15 : f32 to vector<1x256xf32>
    %20 = arith.divf %18, %19 : vector<1x256xf32>
    %21 = vector.broadcast %20 : vector<1x256xf32> to vector<16x256xf32>
    %22 = arith.subf %14, %21 : vector<16x256xf32>
    %23 = arith.mulf %22, %22 : vector<16x256xf32>
    %cst_16 = arith.constant dense<0.000000e+00> : vector<256xf32>
    %24 = vector.multi_reduction <add>, %23, %cst_16 [0] : vector<16x256xf32> to vector<256xf32>
    %25 = vector.shape_cast %24 : vector<256xf32> to vector<1x256xf32>
    %cst_17 = arith.constant 1.600000e+01 : f32
    %26 = vector.broadcast %cst_17 : f32 to vector<1x256xf32>
    %27 = arith.divf %25, %26 : vector<1x256xf32>
    %cst_18 = arith.constant 8.000000e-01 : f32
    %28 = vector.broadcast %cst_18 : f32 to vector<1x256xf32>
    %29 = arith.addf %27, %28 : vector<1x256xf32>
    %30 = math.rsqrt %29 : vector<1x256xf32>
    %31 = vector.broadcast %30 : vector<1x256xf32> to vector<16x256xf32>
    %32 = arith.mulf %22, %31 : vector<16x256xf32>
    %33 = vector.broadcast %15 : vector<1x256xf32> to vector<16x256xf32>
    %34 = arith.mulf %32, %33 : vector<16x256xf32>
    %35 = vector.broadcast %16 : vector<1x256xf32> to vector<16x256xf32>
    %36 = arith.addf %34, %35 : vector<16x256xf32>
    %cst_19 = arith.constant 0.000000e+00 : f32
    %37 = vector.broadcast %cst_19 : f32 to vector<16x256xf32>
    %38 = arith.cmpf ogt, %36, %37 : vector<16x256xf32>
    %cst_20 = arith.constant 2.000000e-01 : f32
    %39 = vector.broadcast %cst_20 : f32 to vector<16x256xf32>
    %40 = arith.mulf %39, %36 : vector<16x256xf32>
    %41 = arith.select %38, %36, %40 : vector<16x256xi1>, vector<16x256xf32>
    %42 = arith.truncf %41 : vector<16x256xf32> to vector<16x256xbf16>
    %c0_21 = arith.constant 0 : index
    %c0_22 = arith.constant 0 : index
    %43 = vector.load %arg7[%c0_21, %c0_22] : memref<256x512xbf16, #tpu.memory_space<vmem>>, vector<256x512xbf16>
    %cst_23 = arith.constant dense<0.000000e+00> : vector<16x512xf32>
    %44 = tpu.matmul %42, %43, %cst_23 {dimension_numbers = #tpu.dot_dimension_numbers<[1], [0], [0], [1], [0, 0, 1, 1], [], []>} : vector<16x256xbf16>, vector<256x512xbf16>, vector<16x512xf32> -> vector<16x512xf32>
    %c0_24 = arith.constant 0 : index
    %c0_25 = arith.constant 0 : index
    %45 = vector.load %arg8[%c0_24, %c0_25] : memref<1x512xf32, #tpu.memory_space<vmem>>, vector<1x512xf32>
    %c0_26 = arith.constant 0 : index
    %c0_27 = arith.constant 0 : index
    %46 = vector.load %arg9[%c0_26, %c0_27] : memref<1x512xf32, #tpu.memory_space<vmem>>, vector<1x512xf32>
    %cst_28 = arith.constant dense<0.000000e+00> : vector<512xf32>
    %47 = vector.multi_reduction <add>, %44, %cst_28 [0] : vector<16x512xf32> to vector<512xf32>
    %48 = vector.shape_cast %47 : vector<512xf32> to vector<1x512xf32>
    %cst_29 = arith.constant 1.600000e+01 : f32
    %49 = vector.broadcast %cst_29 : f32 to vector<1x512xf32>
    %50 = arith.divf %48, %49 : vector<1x512xf32>
    %51 = vector.broadcast %50 : vector<1x512xf32> to vector<16x512xf32>
    %52 = arith.subf %44, %51 : vector<16x512xf32>
    %53 = arith.mulf %52, %52 : vector<16x512xf32>
    %cst_30 = arith.constant dense<0.000000e+00> : vector<512xf32>
    %54 = vector.multi_reduction <add>, %53, %cst_30 [0] : vector<16x512xf32> to vector<512xf32>
    %55 = vector.shape_cast %54 : vector<512xf32> to vector<1x512xf32>
    %cst_31 = arith.constant 1.600000e+01 : f32
    %56 = vector.broadcast %cst_31 : f32 to vector<1x512xf32>
    %57 = arith.divf %55, %56 : vector<1x512xf32>
    %cst_32 = arith.constant 8.000000e-01 : f32
    %58 = vector.broadcast %cst_32 : f32 to vector<1x512xf32>
    %59 = arith.addf %57, %58 : vector<1x512xf32>
    %60 = math.rsqrt %59 : vector<1x512xf32>
    %61 = vector.broadcast %60 : vector<1x512xf32> to vector<16x512xf32>
    %62 = arith.mulf %52, %61 : vector<16x512xf32>
    %63 = vector.broadcast %45 : vector<1x512xf32> to vector<16x512xf32>
    %64 = arith.mulf %62, %63 : vector<16x512xf32>
    %65 = vector.broadcast %46 : vector<1x512xf32> to vector<16x512xf32>
    %66 = arith.addf %64, %65 : vector<16x512xf32>
    %cst_33 = arith.constant 0.000000e+00 : f32
    %67 = vector.broadcast %cst_33 : f32 to vector<16x512xf32>
    %68 = arith.cmpf ogt, %66, %67 : vector<16x512xf32>
    %cst_34 = arith.constant 2.000000e-01 : f32
    %69 = vector.broadcast %cst_34 : f32 to vector<16x512xf32>
    %70 = arith.mulf %69, %66 : vector<16x512xf32>
    %71 = arith.select %68, %66, %70 : vector<16x512xi1>, vector<16x512xf32>
    %72 = arith.truncf %71 : vector<16x512xf32> to vector<16x512xbf16>
    %c0_35 = arith.constant 0 : index
    %c0_36 = arith.constant 0 : index
    %73 = vector.load %arg10[%c0_35, %c0_36] : memref<512x1024xbf16, #tpu.memory_space<vmem>>, vector<512x1024xbf16>
    %cst_37 = arith.constant dense<0.000000e+00> : vector<16x1024xf32>
    %74 = tpu.matmul %72, %73, %cst_37 {dimension_numbers = #tpu.dot_dimension_numbers<[1], [0], [0], [1], [0, 0, 1, 1], [], []>} : vector<16x512xbf16>, vector<512x1024xbf16>, vector<16x1024xf32> -> vector<16x1024xf32>
    %c0_38 = arith.constant 0 : index
    %c0_39 = arith.constant 0 : index
    %75 = vector.load %arg11[%c0_38, %c0_39] : memref<1x1024xf32, #tpu.memory_space<vmem>>, vector<1x1024xf32>
    %c0_40 = arith.constant 0 : index
    %c0_41 = arith.constant 0 : index
    %76 = vector.load %arg12[%c0_40, %c0_41] : memref<1x1024xf32, #tpu.memory_space<vmem>>, vector<1x1024xf32>
    %cst_42 = arith.constant dense<0.000000e+00> : vector<1024xf32>
    %77 = vector.multi_reduction <add>, %74, %cst_42 [0] : vector<16x1024xf32> to vector<1024xf32>
    %78 = vector.shape_cast %77 : vector<1024xf32> to vector<1x1024xf32>
    %cst_43 = arith.constant 1.600000e+01 : f32
    %79 = vector.broadcast %cst_43 : f32 to vector<1x1024xf32>
    %80 = arith.divf %78, %79 : vector<1x1024xf32>
    %81 = vector.broadcast %80 : vector<1x1024xf32> to vector<16x1024xf32>
    %82 = arith.subf %74, %81 : vector<16x1024xf32>
    %83 = arith.mulf %82, %82 : vector<16x1024xf32>
    %cst_44 = arith.constant dense<0.000000e+00> : vector<1024xf32>
    %84 = vector.multi_reduction <add>, %83, %cst_44 [0] : vector<16x1024xf32> to vector<1024xf32>
    %85 = vector.shape_cast %84 : vector<1024xf32> to vector<1x1024xf32>
    %cst_45 = arith.constant 1.600000e+01 : f32
    %86 = vector.broadcast %cst_45 : f32 to vector<1x1024xf32>
    %87 = arith.divf %85, %86 : vector<1x1024xf32>
    %cst_46 = arith.constant 8.000000e-01 : f32
    %88 = vector.broadcast %cst_46 : f32 to vector<1x1024xf32>
    %89 = arith.addf %87, %88 : vector<1x1024xf32>
    %90 = math.rsqrt %89 : vector<1x1024xf32>
    %91 = vector.broadcast %90 : vector<1x1024xf32> to vector<16x1024xf32>
    %92 = arith.mulf %82, %91 : vector<16x1024xf32>
    %93 = vector.broadcast %75 : vector<1x1024xf32> to vector<16x1024xf32>
    %94 = arith.mulf %92, %93 : vector<16x1024xf32>
    %95 = vector.broadcast %76 : vector<1x1024xf32> to vector<16x1024xf32>
    %96 = arith.addf %94, %95 : vector<16x1024xf32>
    %cst_47 = arith.constant 0.000000e+00 : f32
    %97 = vector.broadcast %cst_47 : f32 to vector<16x1024xf32>
    %98 = arith.cmpf ogt, %96, %97 : vector<16x1024xf32>
    %cst_48 = arith.constant 2.000000e-01 : f32
    %99 = vector.broadcast %cst_48 : f32 to vector<16x1024xf32>
    %100 = arith.mulf %99, %96 : vector<16x1024xf32>
    %101 = arith.select %98, %96, %100 : vector<16x1024xi1>, vector<16x1024xf32>
    %102 = arith.truncf %101 : vector<16x1024xf32> to vector<16x1024xbf16>
    %c0_49 = arith.constant 0 : index
    %c0_50 = arith.constant 0 : index
    %103 = vector.load %arg13[%c0_49, %c0_50] : memref<16x1024xbf16, #tpu.memory_space<vmem>>, vector<16x1024xbf16>
    tpu.vector_store %arg13[%c0_49, %c0_50], %102 {strides = array<i32>} : memref<16x1024xbf16, #tpu.memory_space<vmem>>, vector<16x1024xbf16>,
    return
  }
  func.func @transform_0(%arg0: i32) -> (i32, i32) {
    %c0_i32 = arith.constant 0 : i32
    %c0_i32_0 = arith.constant 0 : i32
    %c0_i32_1 = arith.constant 0 : i32
    return %c0_i32, %c0_i32_0 : i32, i32
  }
  func.func @transform_1(%arg0: i32) -> (i32, i32) {
    %c0_i32 = arith.constant 0 : i32
    %c0_i32_0 = arith.constant 0 : i32
    %c0_i32_1 = arith.constant 0 : i32
    return %c0_i32, %c0_i32_0 : i32, i32
  }
  func.func @transform_2(%arg0: i32) -> (i32, i32) {
    %c0_i32 = arith.constant 0 : i32
    %c0_i32_0 = arith.constant 0 : i32
    %c0_i32_1 = arith.constant 0 : i32
    return %c0_i32, %c0_i32_0 : i32, i32
  }
  func.func @transform_3(%arg0: i32) -> (i32, i32) {
    %c0_i32 = arith.constant 0 : i32
    %c0_i32_0 = arith.constant 0 : i32
    %c0_i32_1 = arith.constant 0 : i32
    return %c0_i32, %c0_i32_0 : i32, i32
  }
  func.func @transform_4(%arg0: i32) -> (i32, i32) {
    %c0_i32 = arith.constant 0 : i32
    %c0_i32_0 = arith.constant 0 : i32
    %c0_i32_1 = arith.constant 0 : i32
    return %c0_i32, %c0_i32_0 : i32, i32
  }
  func.func @transform_5(%arg0: i32) -> (i32, i32) {
    %c0_i32 = arith.constant 0 : i32
    %c0_i32_0 = arith.constant 0 : i32
    %c0_i32_1 = arith.constant 0 : i32
    return %c0_i32, %c0_i32_0 : i32, i32
  }
  func.func @transform_6(%arg0: i32) -> (i32, i32) {
    %c0_i32 = arith.constant 0 : i32
    %c0_i32_0 = arith.constant 0 : i32
    %c0_i32_1 = arith.constant 0 : i32
    return %c0_i32, %c0_i32_0 : i32, i32
  }
  func.func @transform_7(%arg0: i32) -> (i32, i32) {
    %c0_i32 = arith.constant 0 : i32
    %c0_i32_0 = arith.constant 0 : i32
    %c0_i32_1 = arith.constant 0 : i32
    return %c0_i32, %c0_i32_0 : i32, i32
  }
  func.func @transform_8(%arg0: i32) -> (i32, i32) {
    %c0_i32 = arith.constant 0 : i32
    %c0_i32_0 = arith.constant 0 : i32
    %c0_i32_1 = arith.constant 0 : i32
    return %c0_i32, %c0_i32_0 : i32, i32
  }
  func.func @transform_9(%arg0: i32) -> (i32, i32) {
    %c0_i32 = arith.constant 0 : i32
    %c0_i32_0 = arith.constant 0 : i32
    %c0_i32_1 = arith.constant 0 : i32
    return %c0_i32, %c0_i32_0 : i32, i32
  }
  func.func @transform_10(%arg0: i32) -> (i32, i32) {
    %c0_i32 = arith.constant 0 : i32
    %c0_i32_0 = arith.constant 0 : i32
    %c0_i32_1 = arith.constant 0 : i32
    return %c0_i32, %c0_i32_0 : i32, i32
  }
  func.func @transform_11(%arg0: i32) -> (i32, i32) {
    %c0_i32 = arith.constant 0 : i32
    %c0_i32_0 = arith.constant 0 : i32
    %c0_i32_1 = arith.constant 0 : i32
    return %c0_i32, %c0_i32_0 : i32, i32
  }
  func.func @transform_12(%arg0: i32) -> (i32, i32) {
    %c0_i32 = arith.constant 0 : i32
    %c0_i32_0 = arith.constant 0 : i32
    %c0_i32_1 = arith.constant 0 : i32
    return %c0_i32, %c0_i32_0 : i32, i32
  }
}

</mosaic_0001>

<bundles_post_ra>
// kernel: tpu_custom_call.1
= control target key start
LH: loop header
LB: loop body
LE: loop exit
PB: predicated region body
PF: predicated region fallthrough
CT: control target
= control target key end

     0   :  { %17 = vsyncpa [#allocation3], 0  ;;  %s4667_s0 = inlined_call_operand.hbm [shape: f32[16,128], index: 0, kind: input, shape index: {}]   ;;  %s4668_s1 = inlined_call_operand.hbm [shape: bf16[128,128], index: 1, kind: input, shape index: {}]   ;;  %s4669_s2 = inlined_call_operand.hbm [shape: f32[1,128], index: 2, kind: input, shape index: {}]   ;;  %s4670_s3 = inlined_call_operand.hbm [shape: bf16[128,256], index: 3, kind: input, shape index: {}]   ;;  %s4671_s4 = inlined_call_operand.vmem [shape: f32[1,256], index: 4, kind: input, shape index: {}]   ;;  %s4672_s5 = inlined_call_operand.hbm [shape: f32[1,256], index: 5, kind: input, shape index: {}]   ;;  %s4673_s6 = inlined_call_operand.hbm [shape: bf16[256,512], index: 6, kind: input, shape index: {}]   ;;  %s4674_s7 = inlined_call_operand.vmem [shape: f32[1,512], index: 7, kind: input, shape index: {}]   ;;  %s4675_s8 = inlined_call_operand.vmem [shape: f32[1,512], index: 8, kind: input, shape index: {}]   ;;  %s4676_s9 = inlined_call_operand.hbm [shape: bf16[512,1024], index: 9, kind: input, shape index: {}]   ;;  %s4677_s10 = inlined_call_operand.vmem [shape: f32[1,1024], index: 10, kind: input, shape index: {}]   ;;  %s4678_s11 = inlined_call_operand.vmem [shape: f32[1,1024], index: 11, kind: input, shape index: {}]   ;;  %s4679_s12 = inlined_call_operand.hbm [shape: bf16[16,1024], index: 12, kind: output, shape index: {}]  }
   0x1   :  { %18 = vsyncpa [#allocation6], 0 }
   0x2   :  { %19 = vsyncpa [#allocation9], 0 }
   0x3   :  { %20 = vsyncpa [#allocation12], 0 }
   0x4   :  { %21 = vsyncpa [#allocation4], 0  ;;  %s4223_s21 = smov [#allocation5]   ;;  %s4037_s25 = scalar_lea.hbm %s4668_s1, 1024 }
   0x5   :  { %s39_s22 = sshll.u32 %s4223_s21, 4  ;;  %p4038_p0 = scmp.ne.s32.totalorder %s4668_s1, %s4037_s25  ;;  %s40_s22 = int_to_ptr.vmem [resolvable:$true] %s39_s22 }
   0x6   :  { %p4041_p1 = scmp.lt.u32.totalorder %s4037_s25, %s4668_s1 }
   0x8   :  { %p4043_p2 = pnand %p4041_p1, %p4038_p0 }
   0xa   :  { %4046 = shalt.err (!%p4043_p2)
}
   0xb   :  { %s4047_s30 = scalar_lea.vmem %s40_s22, 1024  ;;  %p4052_p4 = scmp.lt.s32.totalorder %s40_s22, %s40_s22 }
   0xc   :  { %p4048_p3 = scmp.ne.s32.totalorder %s40_s22, %s4047_s30  ;;  %p4053_p5 = scmp.lt.s32.totalorder %s4047_s30, %s4047_s30 }
   0xe   :  { %p4054_p6 = por %p4053_p5, %p4052_p4 }
  0x10   :  { %p4055_p7 = pnand %p4054_p6, %p4048_p3 }
  0x12   :  { %4058 = shalt.err (!%p4055_p7)
}
  0x13   :  { %s4224_s13 = smov 64   ;;  %s4225_s14 = smov 4  }
  0x14   :  { %45 = dma.hbm_to_vmem [thread:$0]  %s4668_s1, 1024, %s40_s22, [#allocation6], %s4224_s13, %s4224_s13, %s4225_s14  }
  0x15   :  { %s4226_s17 = smov [#allocation8]   ;;  %s4227_s19 = smov [#allocation11]  }
  0x16   :  { %s61_s18 = sshll.u32 %s4226_s17, 4  ;;  %s85_s20 = sshll.u32 %s4227_s19, 4  ;;  %s62_s18 = int_to_ptr.vmem [resolvable:$true] %s61_s18  ;;  %s86_s20 = int_to_ptr.vmem [resolvable:$true] %s85_s20 }
  0x17   :  { %s4059_s24 = scalar_lea.hbm %s4670_s3, 2048 }
  0x18   :  { %p4060_p8 = scmp.ne.s32.totalorder %s4670_s3, %s4059_s24  ;;  %p4063_p9 = scmp.lt.u32.totalorder %s4059_s24, %s4670_s3 }
  0x1a   :  { %p4065_p10 = pnand %p4063_p9, %p4060_p8 }
  0x1c   :  { %4068 = shalt.err (!%p4065_p10)
}
  0x1d   :  { %s4069_s1 = scalar_lea.vmem %s62_s18, 2048  ;;  %p4074_p12 = scmp.lt.s32.totalorder %s62_s18, %s62_s18 }
  0x1e   :  { %p4070_p11 = scmp.ne.s32.totalorder %s62_s18, %s4069_s1  ;;  %p4075_p13 = scmp.lt.s32.totalorder %s4069_s1, %s4069_s1 }
  0x20   :  { %p4076_p0 = por %p4075_p13, %p4074_p12 }
  0x22   :  { %p4077_p1 = pnand %p4076_p0, %p4070_p11 }
  0x24   :  { %4080 = shalt.err (!%p4077_p1)
}
  0x25   :  { %s4228_s22 = smov 128   ;;  %s4229_s29 = smov 8  }
  0x26   :  { %67 = dma.hbm_to_vmem [thread:$0]  %s4670_s3, 2048, %s62_s18, [#allocation9], %s4228_s22, %s4228_s22, %s4229_s29  }
  0x27   :  { %s4081_s16 = scalar_lea.hbm %s4673_s6, 8192 }
  0x28   :  { %p4082_p2 = scmp.ne.s32.totalorder %s4673_s6, %s4081_s16  ;;  %p4085_p3 = scmp.lt.u32.totalorder %s4081_s16, %s4673_s6 }
  0x2a   :  { %p4087_p4 = pnand %p4085_p3, %p4082_p2 }
  0x2c   :  { %4090 = shalt.err (!%p4087_p4)
}
  0x2d   :  { %s4091_s24 = scalar_lea.vmem %s86_s20, 8192  ;;  %p4096_p6 = scmp.lt.s32.totalorder %s86_s20, %s86_s20 }
  0x2e   :  { %p4092_p5 = scmp.ne.s32.totalorder %s86_s20, %s4091_s24  ;;  %p4097_p7 = scmp.lt.s32.totalorder %s4091_s24, %s4091_s24 }
  0x30   :  { %p4098_p8 = por %p4097_p7, %p4096_p6 }
  0x32   :  { %p4099_p9 = pnand %p4098_p8, %p4092_p5 }
  0x34   :  { %4102 = shalt.err (!%p4099_p9)
}
  0x35   :  { %s4230_s3 = smov 256   ;;  %s4231_s18 = smov 16  }
  0x36   :  { %91 = dma.hbm_to_vmem [thread:$0]  %s4673_s6, 8192, %s86_s20, [#allocation12], %s4230_s3, %s4230_s3, %s4231_s18  }
  0x37   :  { %s4232_s27 = smov [#allocation2]   ;;  %s4233_s1 = smov [#allocation7]  }
  0x38   :  { %s27_s28 = sshll.u32 %s4232_s27, 4  ;;  %s52_s30 = sshll.u32 %s4233_s1, 4  ;;  %s28_s28 = int_to_ptr.vmem [resolvable:$true] %s27_s28  ;;  %s53_s30 = int_to_ptr.vmem [resolvable:$true] %s52_s30 }
  0x39   :  { %s4103_s15 = scalar_lea.hbm %s4667_s0, 256 }
  0x3a   :  { %p4104_p10 = scmp.ne.s32.totalorder %s4667_s0, %s4103_s15  ;;  %p4107_p11 = scmp.lt.u32.totalorder %s4103_s15, %s4667_s0 }
  0x3c   :  { %p4109_p12 = pnand %p4107_p11, %p4104_p10 }
  0x3e   :  { %4112 = shalt.err (!%p4109_p12)
}
  0x3f   :  { %s4113_s6 = scalar_lea.vmem %s28_s28, 256  ;;  %p4118_p0 = scmp.lt.s32.totalorder %s28_s28, %s28_s28 }
  0x40   :  { %p4114_p13 = scmp.ne.s32.totalorder %s28_s28, %s4113_s6  ;;  %p4119_p1 = scmp.lt.s32.totalorder %s4113_s6, %s4113_s6 }
  0x42   :  { %p4120_p2 = por %p4119_p1, %p4118_p0 }
  0x44   :  { %p4121_p3 = pnand %p4120_p2, %p4114_p13 }
  0x46   :  { %4124 = shalt.err (!%p4121_p3)
}
  0x47   :  { %33 = dma.hbm_to_vmem [thread:$0]  %s4667_s0, 256, %s28_s28, [#allocation3], %s4228_s22, %s4228_s22, %s4229_s29  }
  0x48   :  { %s4125_s18 = scalar_lea.hbm %s4669_s2, 16 }
  0x49   :  { %p4126_p4 = scmp.ne.s32.totalorder %s4669_s2, %s4125_s18  ;;  %p4129_p5 = scmp.lt.u32.totalorder %s4125_s18, %s4669_s2 }
  0x4b   :  { %p4131_p6 = pnand %p4129_p5, %p4126_p4 }
  0x4d   :  { %4134 = shalt.err (!%p4131_p6)
}
  0x4e   :  { %s4135_s13 = scalar_lea.vmem %s53_s30, 16  ;;  %s4139_s14 = scalar_lea.vmem %s53_s30, 32 }
  0x4f   :  { %p4136_p7 = scmp.ne.s32.totalorder %s53_s30, %s4135_s13  ;;  %p4140_p8 = scmp.lt.s32.totalorder %s53_s30, %s53_s30 }
  0x50   :  { %p4141_p9 = scmp.lt.s32.totalorder %s4139_s14, %s4135_s13 }
  0x52   :  { %p4142_p10 = por %p4141_p9, %p4140_p8 }
  0x54   :  { %p4143_p11 = pnand %p4142_p10, %p4136_p7 }
  0x56   :  { %4146 = shalt.err (!%p4143_p11)
}
  0x57   :  { %55 = dma.hbm_to_vmem [thread:$0]  %s4669_s2, 16, %s53_s30, [#allocation6]  }
  0x58   :  { %s4234_s29 = smov [#allocation10]   ;;  %s4235_s15 = smov [#allocation13]  }
  0x59   :  { %s76_s28 = sshll.u32 %s4234_s29, 4  ;;  %s101_s16 = sshll.u32 %s4235_s15, 4  ;;  %s77_s28 = int_to_ptr.vmem [resolvable:$true] %s76_s28  ;;  %s102_s16 = int_to_ptr.vmem [resolvable:$true] %s101_s16 }
  0x5a   :  { %s4147_s21 = scalar_lea.hbm %s4672_s5, 32 }
  0x5b   :  { %p4148_p12 = scmp.ne.s32.totalorder %s4672_s5, %s4147_s21  ;;  %p4151_p13 = scmp.lt.u32.totalorder %s4147_s21, %s4672_s5 }
  0x5d   :  { %p4153_p0 = pnand %p4151_p13, %p4148_p12 }
  0x5f   :  { %4156 = shalt.err (!%p4153_p0)
}
  0x60   :  { %s4157_s2 = scalar_lea.vmem %s77_s28, 32  ;;  %p4162_p2 = scmp.lt.s32.totalorder %s77_s28, %s77_s28 }
  0x61   :  { %p4158_p1 = scmp.ne.s32.totalorder %s77_s28, %s4157_s2  ;;  %p4163_p3 = scmp.lt.s32.totalorder %s4157_s2, %s4157_s2 }
  0x63   :  { %p4164_p4 = por %p4163_p3, %p4162_p2 }
  0x65   :  { %p4165_p5 = pnand %p4164_p4, %p4158_p1 }
  0x67   :  { %4168 = shalt.err (!%p4165_p5)
}
  0x68   :  { %79 = dma.hbm_to_vmem [thread:$0]  %s4672_s5, 32, %s77_s28, [#allocation9]  }
  0x69   :  { %s4169_s26 = scalar_lea.hbm %s4676_s9, 32768 }
  0x6a   :  { %p4170_p6 = scmp.ne.s32.totalorder %s4676_s9, %s4169_s26  ;;  %p4173_p7 = scmp.lt.u32.totalorder %s4169_s26, %s4676_s9 }
  0x6c   :  { %p4175_p8 = pnand %p4173_p7, %p4170_p6 }
  0x6e   :  { %4178 = shalt.err (!%p4175_p8)
}
  0x6f   :  { %s4179_s0 = scalar_lea.vmem %s102_s16, 32768  ;;  %p4184_p10 = scmp.lt.s32.totalorder %s102_s16, %s102_s16 }
  0x70   :  { %p4180_p9 = scmp.ne.s32.totalorder %s102_s16, %s4179_s0  ;;  %p4185_p11 = scmp.lt.s32.totalorder %s4179_s0, %s4179_s0 }
  0x72   :  { %p4186_p12 = por %p4185_p11, %p4184_p10 }
  0x74   :  { %p4187_p13 = pnand %p4186_p12, %p4180_p9 }
  0x76   :  { %4190 = shalt.err (!%p4187_p13)
}
  0x77   :  { %s4236_s5 = smov 512   ;;  %s4237_s22 = smov 32  }
  0x78   :  { %107 = dma.hbm_to_vmem [thread:$0]  %s4676_s9, 32768, %s102_s16, [#allocation12], %s4236_s5, %s4236_s5, %s4237_s22  }
  0x79   :  { %4213 = dma.done.wait [#allocation3], 256  }
  0x7a   :  { %4214 = vsyncadd [#allocation3], 4294967040 }
  0x7b   :  { %4215 = dma.done.wait [#allocation6], 1040  }
  0x7c   :  { %4216 = vsyncadd [#allocation6], 4294966256 }
  0x7d   :  { %4217 = dma.done.wait [#allocation9], 2080  }
  0x7e   :  { %4218 = vsyncadd [#allocation9], 4294965216 }
  0x7f   :  { %4219 = dma.done.wait [#allocation12], 40960  }
  0x80   :  { %4220 = vsyncadd [#allocation12], 4294926336  ;;  %v4238_v0 = vmov 0.0   ;;  %vm4239_vm0 = vmmov 0   ;;  %v3881_v1 = vld [vmem:[#allocation5] sm:$0xff]   ;;  %v3882_v2 = vld [vmem:[#allocation5 + $0x8] sm:$0xff]  }
  0x81   :  { %3826 = vmatprep.subr.bf16.mxu0 %v4238_v0  ;;  %3842 = vmatprep.mubr.msk.bf16.mxu0 %vm4239_vm0, %v4238_v0  ;;  %v3883_v3 = vld [vmem:[#allocation5 + $0x10] sm:$0xff]   ;;  %v3884_v4 = vld [vmem:[#allocation5 + $0x18] sm:$0xff]   ;;  %v3891_v6 = vld [vmem:[#allocation8] ss:$8 sps:$4 sm:$0xff]   ;;  %v4240_v28 = vmov 0  }
  0x82   :  { %3827 = vmatpush3.bf16.msra.mxu0 %v3881_v1  ;;  %v3889_v5 = vld [vmem:[#allocation8 + $0x4] ss:$8 sps:$4 sm:$0xff]   ;;  %v3892_v7 = vld [vmem:[#allocation8 + $0x14] ss:$8 sps:$4 sm:$0xff]   ;;  %v3894_v8 = vld [vmem:[#allocation8 + $0x10] ss:$8 sps:$4 sm:$0xff]   ;;  %384 = vmatprep.mubr.bf16.mxu1 %v4240_v28 }
  0x83   :  { %3828 = vmatprep.subr.bf16.mxu0 %v4238_v0  ;;  %352 = vmatprep.subr.bf16.mxu1 %v3889_v5  ;;  %v3895_v9 = vld [vmem:[#allocation8 + $0x24] ss:$8 sps:$4 sm:$0xff]   ;;  %v3897_v12 = vld [vmem:[#allocation8 + $0x20] ss:$8 sps:$4 sm:$0xff]   ;;  %v3898_v13 = vld [vmem:[#allocation8 + $0x34] ss:$8 sps:$4 sm:$0xff]  }
  0x84   :  { %353 = vmatpush1.bf16.msra.mxu1 %v3891_v6  ;;  %v3885_v10 = vld [vmem:[#allocation5 + $0x20] sm:$0xff]   ;;  %v3886_v11 = vld [vmem:[#allocation5 + $0x28] sm:$0xff]   ;;  %v3900_v14 = vld [vmem:[#allocation8 + $0x30] ss:$8 sps:$4 sm:$0xff]  }
  0x85   :  { %354 = vmatprep.subr.bf16.mxu1 %v3892_v7  ;;  %v3901_v15 = vld [vmem:[#allocation8 + $0x44] ss:$8 sps:$4 sm:$0xff]   ;;  %v3903_v17 = vld [vmem:[#allocation8 + $0x40] ss:$8 sps:$4 sm:$0xff]   ;;  %v3904_v18 = vld [vmem:[#allocation8 + $0x54] ss:$8 sps:$4 sm:$0xff]  }
  0x86   :  { %3829 = vmatpush3.bf16.msra.mxu0 %v3882_v2  ;;  %v3887_v16 = vld [vmem:[#allocation5 + $0x30] sm:$0xff]   ;;  %v3888_v19 = vld [vmem:[#allocation5 + $0x38] sm:$0xff]   ;;  %v3909_v25 = vld [vmem:[#allocation8 + $0x60] ss:$8 sps:$4 sm:$0xff]  }
  0x87   :  { %3830 = vmatprep.subr.bf16.mxu0 %v4238_v0  ;;  %v134_v20 = vld [vmem:[#allocation2] sm:$0xff]  ;;  %v135_v21 = vld [vmem:[#allocation2 + $0x8] sm:$0xff]  ;;  %v3456_v29 = vld [vmem:[#allocation7] ss:$0 sm:$0xff] }
  0x88   :  { %355 = vmatpush1.bf16.msra.mxu1 %v3894_v8  ;;  %v3906_v22 = vld [vmem:[#allocation8 + $0x50] ss:$8 sps:$4 sm:$0xff]   ;;  %v136_v23 = vpack.c.bf16 %v135_v21, %v134_v20  ;;  %v3907_v24 = vld [vmem:[#allocation8 + $0x64] ss:$8 sps:$4 sm:$0xff]   ;;  %v3910_v26 = vld [vmem:[#allocation8 + $0x74] ss:$8 sps:$4 sm:$0xff]  }
  0x89   :  { %356 = vmatprep.subr.bf16.mxu1 %v3895_v9  ;;  %v3912_v27 = vld [vmem:[#allocation8 + $0x70] ss:$8 sps:$4 sm:$0xff]  }
  0x8a   :  { %3831 = vmatpush3.bf16.msra.mxu0 %v3883_v3  ;;  %v3915_v41 = vld [vmem:[#allocation11 + $0x4] ss:$16 sps:$4 sm:$0xff]   ;;  %v3918_v42 = vld [vmem:[#allocation11 + $0xc] ss:$16 sps:$4 sm:$0xff]   ;;  %v3913_v43 = vld [vmem:[#allocation11] ss:$16 sps:$4 sm:$0xff]  }
  0x8b   :  { %3832 = vmatprep.subr.bf16.mxu0 %v4238_v0  ;;  %v3916_v44 = vld [vmem:[#allocation11 + $0x8] ss:$16 sps:$4 sm:$0xff]   ;;  %v3921_v45 = vld [vmem:[#allocation11 + $0x24] ss:$16 sps:$4 sm:$0xff]   ;;  %v3924_v46 = vld [vmem:[#allocation11 + $0x2c] ss:$16 sps:$4 sm:$0xff]  }
  0x8c   :  { %357 = vmatpush1.bf16.msra.mxu1 %v3897_v12  ;;  %v3919_v47 = vld [vmem:[#allocation11 + $0x20] ss:$16 sps:$4 sm:$0xff]   ;;  %v3922_v48 = vld [vmem:[#allocation11 + $0x28] ss:$16 sps:$4 sm:$0xff]   ;;  %v3927_v49 = vld [vmem:[#allocation11 + $0x44] ss:$16 sps:$4 sm:$0xff]  }
  0x8d   :  { %358 = vmatprep.subr.bf16.mxu1 %v3898_v13  ;;  %v3930_v50 = vld [vmem:[#allocation11 + $0x4c] ss:$16 sps:$4 sm:$0xff]   ;;  %v3925_v51 = vld [vmem:[#allocation11 + $0x40] ss:$16 sps:$4 sm:$0xff]   ;;  %v3928_v52 = vld [vmem:[#allocation11 + $0x48] ss:$16 sps:$4 sm:$0xff]  }
  0x8e   :  { %3833 = vmatpush3.bf16.msra.mxu0 %v3884_v4  ;;  %v3933_v53 = vld [vmem:[#allocation11 + $0x64] ss:$16 sps:$4 sm:$0xff]   ;;  %v3936_v54 = vld [vmem:[#allocation11 + $0x6c] ss:$16 sps:$4 sm:$0xff]   ;;  %v3931_v55 = vld [vmem:[#allocation11 + $0x60] ss:$16 sps:$4 sm:$0xff]  }
  0x8f   :  { %3834 = vmatprep.subr.bf16.mxu0 %v4238_v0  ;;  %v3934_v56 = vld [vmem:[#allocation11 + $0x68] ss:$16 sps:$4 sm:$0xff]   ;;  %v3939_v57 = vld [vmem:[#allocation11 + $0x84] ss:$16 sps:$4 sm:$0xff]   ;;  %v3942_v58 = vld [vmem:[#allocation11 + $0x8c] ss:$16 sps:$4 sm:$0xff]  }
  0x90   :  { %359 = vmatpush1.bf16.msra.mxu1 %v3900_v14  ;;  %v3937_v59 = vld [vmem:[#allocation11 + $0x80] ss:$16 sps:$4 sm:$0xff]   ;;  %v3940_v60 = vld [vmem:[#allocation11 + $0x88] ss:$16 sps:$4 sm:$0xff]   ;;  %v3945_v61 = vld [vmem:[#allocation11 + $0xa4] ss:$16 sps:$4 sm:$0xff]  }
  0x91   :  { %360 = vmatprep.subr.bf16.mxu1 %v3901_v15  ;;  %v3948_v62 = vld [vmem:[#allocation11 + $0xac] ss:$16 sps:$4 sm:$0xff]   ;;  %v3943_v63 = vld [vmem:[#allocation11 + $0xa0] ss:$16 sps:$4 sm:$0xff]   ;;  %v3951_v1 = vld [vmem:[#allocation11 + $0xc4] ss:$16 sps:$4 sm:$0xff]  }
  0x92   :  { %3835 = vmatpush3.bf16.msra.mxu0 %v3885_v10  ;;  %v3954_v2 = vld [vmem:[#allocation11 + $0xcc] ss:$16 sps:$4 sm:$0xff]   ;;  %v3949_v3 = vld [vmem:[#allocation11 + $0xc0] ss:$16 sps:$4 sm:$0xff]   ;;  %v3952_v4 = vld [vmem:[#allocation11 + $0xc8] ss:$16 sps:$4 sm:$0xff]  }
  0x93   :  { %3836 = vmatprep.subr.bf16.mxu0 %v4238_v0  ;;  %v3957_v5 = vld [vmem:[#allocation11 + $0xe4] ss:$16 sps:$4 sm:$0xff]   ;;  %v3960_v6 = vld [vmem:[#allocation11 + $0xec] ss:$16 sps:$4 sm:$0xff]   ;;  %v3955_v7 = vld [vmem:[#allocation11 + $0xe0] ss:$16 sps:$4 sm:$0xff]  }
  0x94   :  { %361 = vmatpush1.bf16.msra.mxu1 %v3903_v17  ;;  %v3958_v8 = vld [vmem:[#allocation11 + $0xe8] ss:$16 sps:$4 sm:$0xff]   ;;  %v3963_v9 = vld [vmem:[#allocation11 + $0x104] ss:$16 sps:$4 sm:$0xff]   ;;  %v3966_v10 = vld [vmem:[#allocation11 + $0x10c] ss:$16 sps:$4 sm:$0xff]  }
  0x95   :  { %362 = vmatprep.subr.bf16.mxu1 %v3904_v18  ;;  %v3964_v12 = vld [vmem:[#allocation11 + $0x108] ss:$16 sps:$4 sm:$0xff]   ;;  %v3969_v13 = vld [vmem:[#allocation11 + $0x124] ss:$16 sps:$4 sm:$0xff]   ;;  %v3972_v14 = vld [vmem:[#allocation11 + $0x12c] ss:$16 sps:$4 sm:$0xff]  }
  0x96   :  { %3837 = vmatpush3.bf16.msra.mxu0 %v3886_v11  ;;  %v3961_v11 = vld [vmem:[#allocation11 + $0x100] ss:$16 sps:$4 sm:$0xff]   ;;  %v3975_v17 = vld [vmem:[#allocation11 + $0x144] ss:$16 sps:$4 sm:$0xff]   ;;  %v3978_v18 = vld [vmem:[#allocation11 + $0x14c] ss:$16 sps:$4 sm:$0xff]  }
  0x97   :  { %3838 = vmatprep.subr.bf16.mxu0 %v4238_v0  ;;  %v3967_v15 = vld [vmem:[#allocation11 + $0x120] ss:$16 sps:$4 sm:$0xff]   ;;  %v3976_v20 = vld [vmem:[#allocation11 + $0x148] ss:$16 sps:$4 sm:$0xff]   ;;  %v3981_v21 = vld [vmem:[#allocation11 + $0x164] ss:$16 sps:$4 sm:$0xff]  }
  0x98   :  { %363 = vmatpush1.bf16.msra.mxu1 %v3906_v22  ;;  %v3984_v22 = vld [vmem:[#allocation11 + $0x16c] ss:$16 sps:$4 sm:$0xff]   ;;  %v3988_v28 = vld [vmem:[#allocation11 + $0x188] ss:$16 sps:$4 sm:$0xff]  }
  0x99   :  { %364 = vmatprep.subr.bf16.mxu1 %v3907_v24  ;;  %v3982_v24 = vld [vmem:[#allocation11 + $0x168] ss:$16 sps:$4 sm:$0xff]  }
  0x9a   :  { %3839 = vmatpush3.bf16.msra.mxu0 %v3887_v16  ;;  %v3970_v16 = vld [vmem:[#allocation11 + $0x128] ss:$16 sps:$4 sm:$0xff]  }
  0x9b   :  { %3840 = vmatprep.subr.bf16.mxu0 %v4238_v0  ;;  %v3946_v0 = vld [vmem:[#allocation11 + $0xa8] ss:$16 sps:$4 sm:$0xff]  }
  0x9c   :  { %365 = vmatpush1.bf16.msra.mxu1 %v3909_v25  ;;  %v3987_v25 = vld [vmem:[#allocation11 + $0x184] ss:$16 sps:$4 sm:$0xff]  }
  0x9d   :  { %366 = vmatprep.subr.bf16.mxu1 %v3910_v26  ;;  %v3990_v26 = vld [vmem:[#allocation11 + $0x18c] ss:$16 sps:$4 sm:$0xff]  }
  0x9e   :  { %3841 = vmatpush3.bf16.msra.mxu0 %v3888_v19  ;;  %v3973_v19 = vld [vmem:[#allocation11 + $0x140] ss:$16 sps:$4 sm:$0xff]  }
  0x9f   :  { %874 = vmatprep.subr.bf16.mxu0 %v3915_v41 }
  0xa0   :  { %367 = vmatpush1.bf16.msra.mxu1 %v3912_v27  ;;  %v3985_v27 = vld [vmem:[#allocation11 + $0x180] ss:$16 sps:$4 sm:$0xff]  }
  0xa1   :  { %3843 = vmatmul.mubr.bf16.vlgmr.msra.gmra.mrb[0].mxu0 %v136_v23  ;;  %917 = vmatprep.subr.bf16.mxu1 %v3918_v42  ;;  %v3979_v23 = vld [vmem:[#allocation11 + $0x160] ss:$16 sps:$4 sm:$0xff]  }
  0xa2   :  { %875 = vmatpush1.bf16.msra.mxu0 %v3913_v43 }
  0xa3   :  { %876 = vmatprep.subr.bf16.mxu0 %v3921_v45 }
  0xa6   :  { %877 = vmatpush1.bf16.msra.mxu0 %v3919_v47 }
  0xa7   :  { %878 = vmatprep.subr.bf16.mxu0 %v3927_v49 }
  0xaa   :  { %879 = vmatpush1.bf16.msra.mxu0 %v3925_v51 }
  0xab   :  { %880 = vmatprep.subr.bf16.mxu0 %v3933_v53 }
  0xae   :  { %881 = vmatpush1.bf16.msra.mxu0 %v3931_v55 }
  0xaf   :  { %882 = vmatprep.subr.bf16.mxu0 %v3939_v57 }
  0xb2   :  { %883 = vmatpush1.bf16.msra.mxu0 %v3937_v59 }
  0xb3   :  { %884 = vmatprep.subr.bf16.mxu0 %v3945_v61 }
  0xb6   :  { %885 = vmatpush1.bf16.msra.mxu0 %v3943_v63 }
  0xb7   :  { %886 = vmatprep.subr.bf16.mxu0 %v3951_v1 }
  0xba   :  { %887 = vmatpush1.bf16.msra.mxu0 %v3949_v3 }
  0xbb   :  { %888 = vmatprep.subr.bf16.mxu0 %v3957_v5 }
  0xbe   :  { %889 = vmatpush1.bf16.msra.mxu0 %v3955_v7 }
  0xbf   :  { %890 = vmatprep.subr.bf16.mxu0 %v3963_v9 }
  0xc2   :  { %891 = vmatpush1.bf16.msra.mxu0 %v3961_v11 }
  0xc3   :  { %892 = vmatprep.subr.bf16.mxu0 %v3969_v13 }
  0xc6   :  { %893 = vmatpush1.bf16.msra.mxu0 %v3967_v15 }
  0xc7   :  { %894 = vmatprep.subr.bf16.mxu0 %v3975_v17 }
  0xca   :  { %895 = vmatpush1.bf16.msra.mxu0 %v3973_v19 }
  0xcb   :  { %896 = vmatprep.subr.bf16.mxu0 %v3981_v21 }
  0xce   :  { %897 = vmatpush1.bf16.msra.mxu0 %v3979_v23 }
  0xcf   :  { %898 = vmatprep.subr.bf16.mxu0 %v3987_v25 }
  0xd2   :  { %899 = vmatpush1.bf16.msra.mxu0 %v3985_v27 }
 0x174   :  { %v242_v30 = vpop.f32.mrb[0].mxu0 }
 0x175   :  { %v243_v31 = vadd.f32 %v3456_v29, %v242_v30  ;;  %v3844_v32 = vpop.f32.mrb[1].mxu0  ;;  %v3996_v30 = vld [vmem:[#allocation11 + $0x1ac] ss:$16 sps:$4 sm:$0xff]  }
 0x176   :  { %v245_v33 = vpop.f32.mrb[2].mxu0  ;;  %v3994_v32 = vld [vmem:[#allocation11 + $0x1a8] ss:$16 sps:$4 sm:$0xff]  }
 0x177   :  { %v251_v34 = vmul.f32 0.2, %v243_v31  ;;  %v246_v35 = vadd.f32 %v3456_v29, %v245_v33  ;;  %v3845_v36 = vpop.f32.mrb[3].mxu0  ;;  %vm249_vm1 = vcmp.gt.f32.partialorder %v243_v31, 0.0  ;;  %v3993_v29 = vld [vmem:[#allocation11 + $0x1a4] ss:$16 sps:$4 sm:$0xff]  }
 0x178   :  { %900 = vmatprep.subr.bf16.mxu0 %v3993_v29  ;;  %v3999_v33 = vld [vmem:[#allocation11 + $0x1c4] ss:$16 sps:$4 sm:$0xff]   ;;  %v4000_v36 = vld [vmem:[#allocation11 + $0x1c8] ss:$16 sps:$4 sm:$0xff]  }
 0x179   :  { %vm250_vm2 = vcmp.gt.f32.partialorder %v246_v35, 0.0  ;;  %v252_v37 = vmul.f32 0.2, %v246_v35  ;;  %v253_v38 = vsel %vm249_vm1, %v243_v31, %v251_v34  ;;  %v3991_v31 = vld [vmem:[#allocation11 + $0x1a0] ss:$16 sps:$4 sm:$0xff]  }
 0x17a   :  { %901 = vmatpush1.bf16.msra.mxu0 %v3991_v31  ;;  %v4002_v34 = vld [vmem:[#allocation11 + $0x1cc] ss:$16 sps:$4 sm:$0xff]  }
 0x17b   :  { %v254_v39 = vsel %vm250_vm2, %v246_v35, %v252_v37  ;;  %v3997_v35 = vld [vmem:[#allocation11 + $0x1c0] ss:$16 sps:$4 sm:$0xff]   ;;  %902 = vmatprep.subr.bf16.mxu0 %v3999_v33 }
 0x17c   :  { %v255_v40 = vpack.c.bf16 %v254_v39, %v253_v38  ;;  %v4003_v37 = vld [vmem:[#allocation11 + $0x1e0] ss:$16 sps:$4 sm:$0xff]   ;;  %v4005_v38 = vld [vmem:[#allocation11 + $0x1e4] ss:$16 sps:$4 sm:$0xff]   ;;  %v4006_v39 = vld [vmem:[#allocation11 + $0x1e8] ss:$16 sps:$4 sm:$0xff]  }
 0x17e   :  { %385 = vmatmul.mubr.bf16.vlgmr.msra.gmra.mrb[0].mxu1 %v255_v40  ;;  %903 = vmatpush1.bf16.msra.mxu0 %v3997_v35  ;;  %v4008_v40 = vld [vmem:[#allocation11 + $0x1ec] ss:$16 sps:$4 sm:$0xff]  }
 0x17f   :  { %918 = vmatpush1.bf16.msra.mxu1 %v3916_v44  ;;  %904 = vmatprep.subr.bf16.mxu0 %v4005_v38 }
 0x180   :  { %919 = vmatprep.subr.bf16.mxu1 %v3924_v46 }
 0x182   :  { %905 = vmatpush1.bf16.msra.mxu0 %v4003_v37 }
 0x183   :  { %920 = vmatpush1.bf16.msra.mxu1 %v3922_v48 }
 0x184   :  { %921 = vmatprep.subr.bf16.mxu1 %v3930_v50 }
 0x187   :  { %922 = vmatpush1.bf16.msra.mxu1 %v3928_v52 }
 0x188   :  { %923 = vmatprep.subr.bf16.mxu1 %v3936_v54 }
 0x18b   :  { %924 = vmatpush1.bf16.msra.mxu1 %v3934_v56 }
 0x18c   :  { %925 = vmatprep.subr.bf16.mxu1 %v3942_v58 }
 0x18f   :  { %926 = vmatpush1.bf16.msra.mxu1 %v3940_v60 }
 0x190   :  { %927 = vmatprep.subr.bf16.mxu1 %v3948_v62 }
 0x193   :  { %928 = vmatpush1.bf16.msra.mxu1 %v3946_v0 }
 0x194   :  { %929 = vmatprep.subr.bf16.mxu1 %v3954_v2 }
 0x197   :  { %930 = vmatpush1.bf16.msra.mxu1 %v3952_v4 }
 0x198   :  { %931 = vmatprep.subr.bf16.mxu1 %v3960_v6 }
 0x19b   :  { %932 = vmatpush1.bf16.msra.mxu1 %v3958_v8 }
 0x19c   :  { %933 = vmatprep.subr.bf16.mxu1 %v3966_v10 }
 0x19f   :  { %934 = vmatpush1.bf16.msra.mxu1 %v3964_v12 }
 0x1a0   :  { %935 = vmatprep.subr.bf16.mxu1 %v3972_v14 }
 0x1a3   :  { %936 = vmatpush1.bf16.msra.mxu1 %v3970_v16 }
 0x1a4   :  { %937 = vmatprep.subr.bf16.mxu1 %v3978_v18 }
 0x1a7   :  { %938 = vmatpush1.bf16.msra.mxu1 %v3976_v20  ;;  %v447_v20 = vlaneseq }
 0x1a8   :  { %939 = vmatprep.subr.bf16.mxu1 %v3984_v22 }
 0x1ab   :  { %940 = vmatpush1.bf16.msra.mxu1 %v3982_v24  ;;  %v4400_v24 = vshrl.u32 %v447_v20, 7 }
 0x1ac   :  { %941 = vmatprep.subr.bf16.mxu1 %v3990_v26  ;;  %v395_v26 = vld [vmem:[%s4671_s4] sm:$0x3] }
 0x1ad   :  { %v4403_v25 = vsub.s32 0, %v4400_v24  ;;  %v4409_v27 = vsub.s32 1, %v4400_v24 }
 0x1af   :  { %942 = vmatpush1.bf16.msra.mxu1 %v3988_v28  ;;  %v396_v28 = vld [vmem:[#allocation10] sm:$0x3]  ;;  %v450_v29 = vrot.slane %v395_v26, %v4403_v25  ;;  %v454_v31 = vrot.slane %v395_v26, %v4409_v27 }
 0x1b0   :  { %943 = vmatprep.subr.bf16.mxu1 %v3996_v30  ;;  %v465_v35 = vrot.slane %v396_v28, %v4403_v25  ;;  %v469_v38 = vrot.slane %v396_v28, %v4409_v27  ;;  %v1176_v28 = vld [vmem:[#allocation13 + $0x100] sm:$0xff] }
 0x1b3   :  { %944 = vmatpush1.bf16.msra.mxu1 %v3994_v32 }
 0x1b4   :  { %945 = vmatprep.subr.bf16.mxu1 %v4002_v34 }
 0x1b7   :  { %946 = vmatpush1.bf16.msra.mxu1 %v4000_v36 }
 0x1b8   :  { %947 = vmatprep.subr.bf16.mxu1 %v4008_v40 }
 0x1bb   :  { %948 = vmatpush1.bf16.msra.mxu1 %v4006_v39 }
 0x251   :  { %v386_v41 = vpop.f32.mrb[0].mxu1 }
 0x252   :  { %v388_v42 = vpop.f32.mrb[1].mxu1 }
 0x253   :  { %v390_v43 = vpop.f32.mrb[2].mxu1 }
 0x254   :  { %v397_v44 = vadd.f32 %v390_v43, %v386_v41  ;;  %v392_v45 = vpop.f32.mrb[3].mxu1 }
 0x255   :  { %v404_v46 = vadd.f32 %v392_v45, %v388_v42 }
 0x256   :  { %v398_v47 = vrot.slane %v397_v44, 4 }
 0x257   :  { %v405_v48 = vrot.slane %v404_v46, 4 }
 0x258   :  { %v399_v49 = vadd.f32 %v398_v47, %v397_v44 }
 0x259   :  { %v406_v50 = vadd.f32 %v405_v48, %v404_v46 }
 0x25a   :  { %v400_v51 = vrot.slane %v399_v49, 2 }
 0x25b   :  { %v407_v52 = vrot.slane %v406_v50, 2 }
 0x25c   :  { %v401_v53 = vadd.f32 %v400_v51, %v399_v49 }
 0x25d   :  { %v408_v54 = vadd.f32 %v407_v52, %v406_v50 }
 0x25e   :  { %v402_v55 = vrot.slane %v401_v53, 1 }
 0x25f   :  { %v409_v56 = vrot.slane %v408_v54, 1 }
 0x260   :  { %v403_v57 = vadd.f32 %v402_v55, %v401_v53 }
 0x261   :  { %v410_v58 = vadd.f32 %v409_v56, %v408_v54 }
 0x262   :  { %v412_v59 = vmul.f32 0.0625, %v403_v57  ;;  %v1144_v57 = vld [vmem:[#allocation13] sm:$0xff] }
 0x263   :  { %v413_v60 = vmul.f32 0.0625, %v410_v58  ;;  %v1148_v58 = vld [vmem:[#allocation13 + $0x20] sm:$0xff] }
 0x264   :  { %v414_v61 = vsub.f32 %v386_v41, %v412_v59  ;;  %v416_v62 = vsub.f32 %v390_v43, %v412_v59  ;;  %v1145_v59 = vld [vmem:[#allocation13 + $0x8] sm:$0xff] }
 0x265   :  { %v415_v63 = vsub.f32 %v388_v42, %v413_v60  ;;  %v417_v0 = vsub.f32 %v392_v45, %v413_v60  ;;  %v3546_v60 = vcombine.high %v1144_v57, %v1148_v58 }
 0x266   :  { %v418_v1 = vmul.f32 %v414_v61, %v414_v61  ;;  %v420_v2 = vmul.f32 %v416_v62, %v416_v62 }
 0x267   :  { %v419_v3 = vmul.f32 %v415_v63, %v415_v63  ;;  %v421_v4 = vmul.f32 %v417_v0, %v417_v0  ;;  %2680 = vmatprep.subr.bf16.mxu0 %v3546_v60  ;;  %v1208_v60 = vld [vmem:[#allocation13 + $0x200] sm:$0xff] }
 0x268   :  { %v422_v5 = vadd.f32 %v420_v2, %v418_v1  ;;  %v1152_v1 = vld [vmem:[#allocation13 + $0x40] sm:$0xff] }
 0x269   :  { %v429_v6 = vadd.f32 %v421_v4, %v419_v3  ;;  %v1156_v2 = vld [vmem:[#allocation13 + $0x60] sm:$0xff]  ;;  %v1153_v3 = vld [vmem:[#allocation13 + $0x48] sm:$0xff] }
 0x26a   :  { %v423_v7 = vrot.slane %v422_v5, 4  ;;  %v3554_v4 = vcombine.high %v1152_v1, %v1156_v2 }
 0x26b   :  { %v430_v8 = vrot.slane %v429_v6, 4 }
 0x26c   :  { %v424_v9 = vadd.f32 %v423_v7, %v422_v5  ;;  %v1157_v5 = vld [vmem:[#allocation13 + $0x68] sm:$0xff] }
 0x26d   :  { %v431_v10 = vadd.f32 %v430_v8, %v429_v6  ;;  %v3553_v6 = vcombine.low %v1152_v1, %v1156_v2  ;;  %v3555_v7 = vcombine.low %v1153_v3, %v1157_v5  ;;  %v3556_v8 = vcombine.high %v1153_v3, %v1157_v5  ;;  %v1220_v5 = vld [vmem:[#allocation13 + $0x260] sm:$0xff] }
 0x26e   :  { %v425_v11 = vrot.slane %v424_v9, 2 }
 0x26f   :  { %v432_v12 = vrot.slane %v431_v10, 2 }
 0x270   :  { %v426_v13 = vadd.f32 %v425_v11, %v424_v9  ;;  %v1160_v9 = vld [vmem:[#allocation13 + $0x80] sm:$0xff]  ;;  %v1161_v11 = vld [vmem:[#allocation13 + $0x88] sm:$0xff] }
 0x271   :  { %v433_v14 = vadd.f32 %v432_v12, %v431_v10  ;;  %v1164_v10 = vld [vmem:[#allocation13 + $0xa0] sm:$0xff] }
 0x272   :  { %v427_v15 = vrot.slane %v426_v13, 1  ;;  %v3562_v12 = vcombine.high %v1160_v9, %v1164_v10 }
 0x273   :  { %v434_v16 = vrot.slane %v433_v14, 1 }
 0x274   :  { %v428_v17 = vadd.f32 %v427_v15, %v426_v13  ;;  %v1165_v13 = vld [vmem:[#allocation13 + $0xa8] sm:$0xff] }
 0x275   :  { %v435_v18 = vadd.f32 %v434_v16, %v433_v14  ;;  %v3561_v14 = vcombine.low %v1160_v9, %v1164_v10  ;;  %v3563_v15 = vcombine.low %v1161_v11, %v1165_v13  ;;  %v3564_v16 = vcombine.high %v1161_v11, %v1165_v13  ;;  %v1228_v13 = vld [vmem:[#allocation13 + $0x2a0] sm:$0xff] }
 0x276   :  { %v436_v19 = vmul.f32 0.0625, %v428_v17  ;;  %v1168_v17 = vld [vmem:[#allocation13 + $0xc0] sm:$0xff] }
 0x277   :  { %v437_v21 = vmul.f32 0.0625, %v435_v18  ;;  %v1172_v18 = vld [vmem:[#allocation13 + $0xe0] sm:$0xff] }
 0x278   :  { %v438_v22 = vadd.f32 0.8, %v436_v19  ;;  %v1169_v19 = vld [vmem:[#allocation13 + $0xc8] sm:$0xff]  ;;  %v3570_v20 = vcombine.high %v1168_v17, %v1172_v18 }
 0x279   :  { %v439_v23 = vadd.f32 0.8, %v437_v21  ;;  %v1173_v21 = vld [vmem:[#allocation13 + $0xe8] sm:$0xff] }
 0x27a   :  { %4009 = vrsqrt.f32 %v438_v22  ;;  %v3569_v22 = vcombine.low %v1168_v17, %v1172_v18  ;;  %v3572_v26 = vcombine.high %v1169_v19, %v1173_v21 }
 0x27b   :  { %4011 = vrsqrt.f32 %v439_v23  ;;  %v3571_v23 = vcombine.low %v1169_v19, %v1173_v21  ;;  %v1236_v21 = vld [vmem:[#allocation13 + $0x2e0] sm:$0xff] }
 0x284   :  { %v4010_v30 = vpop.eup %4009 }
 0x285   :  { %v4012_v32 = vpop.eup %4011  ;;  %v442_v33 = vmul.f32 %v4010_v30, %v414_v61  ;;  %v444_v34 = vmul.f32 %v4010_v30, %v416_v62  ;;  %v1149_v61 = vld [vmem:[#allocation13 + $0x28] sm:$0xff]  ;;  %v3545_v62 = vcombine.low %v1144_v57, %v1148_v58 }
 0x286   :  { %v443_v36 = vmul.f32 %v4012_v32, %v415_v63  ;;  %v445_v37 = vmul.f32 %v4012_v32, %v417_v0  ;;  %v3547_v63 = vcombine.low %v1145_v59, %v1149_v61  ;;  %v3548_v0 = vcombine.high %v1145_v59, %v1149_v61  ;;  %v1177_v30 = vld [vmem:[#allocation13 + $0x108] sm:$0xff]  ;;  %v1212_v61 = vld [vmem:[#allocation13 + $0x220] sm:$0xff] }
 0x287   :  { %v457_v39 = vmul.f32 %v450_v29, %v442_v33  ;;  %v459_v40 = vmul.f32 %v450_v29, %v444_v34  ;;  %v1180_v29 = vld [vmem:[#allocation13 + $0x120] sm:$0xff]  ;;  %v1181_v32 = vld [vmem:[#allocation13 + $0x128] sm:$0xff]  ;;  %v3609_v1 = vcombine.low %v1208_v60, %v1212_v61 }
 0x288   :  { %v458_v41 = vmul.f32 %v454_v31, %v443_v36  ;;  %v460_v42 = vmul.f32 %v454_v31, %v445_v37  ;;  %2766 = vmatprep.subr.bf16.mxu1 %v3548_v0  ;;  %v3578_v31 = vcombine.high %v1176_v28, %v1180_v29  ;;  %v3577_v33 = vcombine.low %v1176_v28, %v1180_v29  ;;  %v1184_v36 = vld [vmem:[#allocation13 + $0x140] sm:$0xff]  ;;  %v1213_v0 = vld [vmem:[#allocation13 + $0x228] sm:$0xff] }
 0x289   :  { %v472_v43 = vadd.f32 %v465_v35, %v457_v39  ;;  %v474_v44 = vadd.f32 %v465_v35, %v459_v40  ;;  %v3579_v34 = vcombine.low %v1177_v30, %v1181_v32  ;;  %v3580_v35 = vcombine.high %v1177_v30, %v1181_v32  ;;  %v1188_v37 = vld [vmem:[#allocation13 + $0x160] sm:$0xff]  ;;  %v1189_v40 = vld [vmem:[#allocation13 + $0x168] sm:$0xff] }
 0x28a   :  { %v475_v45 = vadd.f32 %v469_v38, %v460_v42  ;;  %v473_v46 = vadd.f32 %v469_v38, %v458_v41  ;;  %v1185_v38 = vld [vmem:[#allocation13 + $0x148] sm:$0xff]  ;;  %v3586_v39 = vcombine.high %v1184_v36, %v1188_v37  ;;  %v3585_v41 = vcombine.low %v1184_v36, %v1188_v37  ;;  %v1244_v32 = vld [vmem:[#allocation13 + $0x320] sm:$0xff] }
 0x28b   :  { %v482_v47 = vmul.f32 0.2, %v474_v44  ;;  %vm476_vm3 = vcmp.gt.f32.partialorder %v472_v43, 0.0  ;;  %vm478_vm4 = vcmp.gt.f32.partialorder %v474_v44, 0.0  ;;  %v480_v48 = vmul.f32 0.2, %v472_v43 }
 0x28c   :  { %vm477_vm5 = vcmp.gt.f32.partialorder %v473_v46, 0.0  ;;  %vm479_vm6 = vcmp.gt.f32.partialorder %v475_v45, 0.0  ;;  %v481_v49 = vmul.f32 0.2, %v473_v46  ;;  %v483_v50 = vmul.f32 0.2, %v475_v45 }
 0x28d   :  { %v484_v51 = vsel %vm476_vm3, %v472_v43, %v480_v48  ;;  %v486_v52 = vsel %vm478_vm4, %v474_v44, %v482_v47  ;;  %v3587_v42 = vcombine.low %v1185_v38, %v1189_v40  ;;  %v3588_v43 = vcombine.high %v1185_v38, %v1189_v40  ;;  %v1192_v44 = vld [vmem:[#allocation13 + $0x180] sm:$0xff]  ;;  %v1197_v48 = vld [vmem:[#allocation13 + $0x1a8] sm:$0xff] }
 0x28e   :  { %v485_v53 = vsel %vm477_vm5, %v473_v46, %v481_v49  ;;  %v487_v54 = vsel %vm479_vm6, %v475_v45, %v483_v50  ;;  %v488_v55 = vpack.c.bf16 %v486_v52, %v484_v51  ;;  %v1196_v45 = vld [vmem:[#allocation13 + $0x1a0] sm:$0xff]  ;;  %v1193_v46 = vld [vmem:[#allocation13 + $0x188] sm:$0xff] }
 0x28f   :  { %v489_v56 = vpack.c.bf16 %v487_v54, %v485_v53  ;;  %v3594_v47 = vcombine.high %v1192_v44, %v1196_v45  ;;  %v3593_v49 = vcombine.low %v1192_v44, %v1196_v45  ;;  %v3595_v50 = vcombine.low %v1193_v46, %v1197_v48  ;;  %v1200_v52 = vld [vmem:[#allocation13 + $0x1c0] sm:$0xff]  ;;  %v1201_v54 = vld [vmem:[#allocation13 + $0x1c8] sm:$0xff] }
 0x290   :  { %v3596_v51 = vcombine.high %v1193_v46, %v1197_v48  ;;  %v1204_v53 = vld [vmem:[#allocation13 + $0x1e0] sm:$0xff] }
 0x291   :  { %906 = vmatprep.mubr.bf16.mxu0 %v489_v56  ;;  %949 = vmatprep.mubr.bf16.mxu1 %v489_v56  ;;  %v1205_v56 = vld [vmem:[#allocation13 + $0x1e8] sm:$0xff]  ;;  %v3601_v57 = vcombine.low %v1200_v52, %v1204_v53  ;;  %v1252_v40 = vld [vmem:[#allocation13 + $0x360] sm:$0xff] }
 0x292   :  { %907 = vmatmul.mubr.bf16.vlgmr.msra.gmra.mrb[4].mxu0 %v488_v55  ;;  %950 = vmatmul.mubr.bf16.vlgmr.msra.gmra.mrb[4].mxu1 %v488_v55  ;;  %v3602_v55 = vcombine.high %v1200_v52, %v1204_v53  ;;  %v3603_v58 = vcombine.low %v1201_v54, %v1205_v56  ;;  %v3604_v59 = vcombine.high %v1201_v54, %v1205_v56  ;;  %v1260_v48 = vld [vmem:[#allocation13 + $0x3a0] sm:$0xff] }
 0x293   :  { %2681 = vmatpush1.bf16.msra.mxu0 %v3545_v62  ;;  %2767 = vmatpush1.bf16.msra.mxu1 %v3547_v63  ;;  %v1209_v62 = vld [vmem:[#allocation13 + $0x208] sm:$0xff]  ;;  %v3610_v63 = vcombine.high %v1208_v60, %v1212_v61  ;;  %v1268_v56 = vld [vmem:[#allocation13 + $0x3e0] sm:$0xff] }
 0x294   :  { %2682 = vmatprep.subr.bf16.mxu0 %v3554_v4  ;;  %2768 = vmatprep.subr.bf16.mxu1 %v3556_v8  ;;  %v3611_v2 = vcombine.low %v1209_v62, %v1213_v0  ;;  %v3612_v3 = vcombine.high %v1209_v62, %v1213_v0  ;;  %v1216_v4 = vld [vmem:[#allocation13 + $0x240] sm:$0xff]  ;;  %v1221_v8 = vld [vmem:[#allocation13 + $0x268] sm:$0xff] }
 0x295   :  { %v3617_v9 = vcombine.low %v1216_v4, %v1220_v5  ;;  %v4417_v0 = vld [vmem:[#allocation13 + $0x420] sm:$0xff] }
 0x297   :  { %2683 = vmatpush1.bf16.msra.mxu0 %v3553_v6  ;;  %2769 = vmatpush1.bf16.msra.mxu1 %v3555_v7  ;;  %v1217_v6 = vld [vmem:[#allocation13 + $0x248] sm:$0xff]  ;;  %v3618_v7 = vcombine.high %v1216_v4, %v1220_v5 }
 0x298   :  { %2684 = vmatprep.subr.bf16.mxu0 %v3562_v12  ;;  %2770 = vmatprep.subr.bf16.mxu1 %v3564_v16  ;;  %v3619_v10 = vcombine.low %v1217_v6, %v1221_v8  ;;  %v3620_v11 = vcombine.high %v1217_v6, %v1221_v8  ;;  %v1224_v12 = vld [vmem:[#allocation13 + $0x280] sm:$0xff]  ;;  %v1229_v16 = vld [vmem:[#allocation13 + $0x2a8] sm:$0xff] }
 0x299   :  { %v3625_v17 = vcombine.low %v1224_v12, %v1228_v13 }
 0x29b   :  { %2685 = vmatpush1.bf16.msra.mxu0 %v3561_v14  ;;  %2771 = vmatpush1.bf16.msra.mxu1 %v3563_v15  ;;  %v1225_v14 = vld [vmem:[#allocation13 + $0x288] sm:$0xff]  ;;  %v3626_v15 = vcombine.high %v1224_v12, %v1228_v13 }
 0x29c   :  { %2686 = vmatprep.subr.bf16.mxu0 %v3570_v20  ;;  %2772 = vmatprep.subr.bf16.mxu1 %v3572_v26  ;;  %v3627_v18 = vcombine.low %v1225_v14, %v1229_v16  ;;  %v3628_v19 = vcombine.high %v1225_v14, %v1229_v16  ;;  %v1232_v20 = vld [vmem:[#allocation13 + $0x2c0] sm:$0xff]  ;;  %v1237_v26 = vld [vmem:[#allocation13 + $0x2e8] sm:$0xff] }
 0x29d   :  { %v3633_v28 = vcombine.low %v1232_v20, %v1236_v21 }
 0x29f   :  { %2687 = vmatpush1.bf16.msra.mxu0 %v3569_v22  ;;  %2773 = vmatpush1.bf16.msra.mxu1 %v3571_v23  ;;  %v1233_v22 = vld [vmem:[#allocation13 + $0x2c8] sm:$0xff]  ;;  %v3634_v23 = vcombine.high %v1232_v20, %v1236_v21 }
 0x2a0   :  { %2688 = vmatprep.subr.bf16.mxu0 %v3578_v31  ;;  %2774 = vmatprep.subr.bf16.mxu1 %v3580_v35  ;;  %v3635_v29 = vcombine.low %v1233_v22, %v1237_v26  ;;  %v3636_v30 = vcombine.high %v1233_v22, %v1237_v26  ;;  %v1240_v31 = vld [vmem:[#allocation13 + $0x300] sm:$0xff]  ;;  %v1245_v35 = vld [vmem:[#allocation13 + $0x328] sm:$0xff] }
 0x2a1   :  { %v3641_v36 = vcombine.low %v1240_v31, %v1244_v32 }
 0x2a3   :  { %2689 = vmatpush1.bf16.msra.mxu0 %v3577_v33  ;;  %2775 = vmatpush1.bf16.msra.mxu1 %v3579_v34  ;;  %v1241_v33 = vld [vmem:[#allocation13 + $0x308] sm:$0xff]  ;;  %v3642_v34 = vcombine.high %v1240_v31, %v1244_v32 }
 0x2a4   :  { %2690 = vmatprep.subr.bf16.mxu0 %v3586_v39  ;;  %2776 = vmatprep.subr.bf16.mxu1 %v3588_v43  ;;  %v3643_v37 = vcombine.low %v1241_v33, %v1245_v35  ;;  %v3644_v38 = vcombine.high %v1241_v33, %v1245_v35  ;;  %v1248_v39 = vld [vmem:[#allocation13 + $0x340] sm:$0xff]  ;;  %v1253_v43 = vld [vmem:[#allocation13 + $0x368] sm:$0xff] }
 0x2a5   :  { %v3649_v44 = vcombine.low %v1248_v39, %v1252_v40 }
 0x2a7   :  { %2691 = vmatpush1.bf16.msra.mxu0 %v3585_v41  ;;  %2777 = vmatpush1.bf16.msra.mxu1 %v3587_v42  ;;  %v1249_v41 = vld [vmem:[#allocation13 + $0x348] sm:$0xff]  ;;  %v3650_v42 = vcombine.high %v1248_v39, %v1252_v40 }
 0x2a8   :  { %2692 = vmatprep.subr.bf16.mxu0 %v3594_v47  ;;  %2778 = vmatprep.subr.bf16.mxu1 %v3596_v51  ;;  %v3651_v45 = vcombine.low %v1249_v41, %v1253_v43  ;;  %v3652_v46 = vcombine.high %v1249_v41, %v1253_v43  ;;  %v1256_v47 = vld [vmem:[#allocation13 + $0x380] sm:$0xff]  ;;  %v1261_v51 = vld [vmem:[#allocation13 + $0x3a8] sm:$0xff] }
 0x2a9   :  { %v3657_v52 = vcombine.low %v1256_v47, %v1260_v48 }
 0x2ab   :  { %2693 = vmatpush1.bf16.msra.mxu0 %v3593_v49  ;;  %2779 = vmatpush1.bf16.msra.mxu1 %v3595_v50  ;;  %v1257_v49 = vld [vmem:[#allocation13 + $0x388] sm:$0xff]  ;;  %v3658_v50 = vcombine.high %v1256_v47, %v1260_v48 }
 0x2ac   :  { %2694 = vmatprep.subr.bf16.mxu0 %v3602_v55  ;;  %2780 = vmatprep.subr.bf16.mxu1 %v3604_v59  ;;  %v3659_v53 = vcombine.low %v1257_v49, %v1261_v51  ;;  %v3660_v54 = vcombine.high %v1257_v49, %v1261_v51  ;;  %v1264_v55 = vld [vmem:[#allocation13 + $0x3c0] sm:$0xff]  ;;  %v1269_v59 = vld [vmem:[#allocation13 + $0x3e8] sm:$0xff] }
 0x2ad   :  { %v3665_v60 = vcombine.low %v1264_v55, %v1268_v56 }
 0x2af   :  { %2695 = vmatpush1.bf16.msra.mxu0 %v3601_v57  ;;  %2781 = vmatpush1.bf16.msra.mxu1 %v3603_v58  ;;  %v1265_v57 = vld [vmem:[#allocation13 + $0x3c8] sm:$0xff]  ;;  %v3666_v58 = vcombine.high %v1264_v55, %v1268_v56 }
 0x2b0   :  { %2696 = vmatprep.subr.bf16.mxu0 %v3610_v63  ;;  %2782 = vmatprep.subr.bf16.mxu1 %v3612_v3  ;;  %v3667_v61 = vcombine.low %v1265_v57, %v1269_v59  ;;  %v3668_v62 = vcombine.high %v1265_v57, %v1269_v59  ;;  %v4415_v63 = vld [vmem:[#allocation13 + $0x400] sm:$0xff]  ;;  %v4423_v3 = vld [vmem:[#allocation13 + $0x428] sm:$0xff] }
 0x2b1   :  { %v3673_v4 = vcombine.low %v4415_v63, %v4417_v0 }
 0x2b3   :  { %2697 = vmatpush1.bf16.msra.mxu0 %v3609_v1  ;;  %2783 = vmatpush1.bf16.msra.mxu1 %v3611_v2  ;;  %v4419_v1 = vld [vmem:[#allocation13 + $0x408] sm:$0xff]  ;;  %v3674_v2 = vcombine.high %v4415_v63, %v4417_v0  ;;  %v1300_v63 = vld [vmem:[#allocation13 + $0x4e0] sm:$0xff] }
 0x2b4   :  { %2698 = vmatprep.subr.bf16.mxu0 %v3618_v7  ;;  %2784 = vmatprep.subr.bf16.mxu1 %v3620_v11  ;;  %v3675_v5 = vcombine.low %v4419_v1, %v4423_v3  ;;  %v3676_v6 = vcombine.high %v4419_v1, %v4423_v3  ;;  %v1297_v0 = vld [vmem:[#allocation13 + $0x4c8] sm:$0xff] }
 0x2b5   :  { %v1301_v1 = vld [vmem:[#allocation13 + $0x4e8] sm:$0xff] }
 0x2b7   :  { %2699 = vmatpush1.bf16.msra.mxu0 %v3617_v9  ;;  %2785 = vmatpush1.bf16.msra.mxu1 %v3619_v10 }
 0x2b8   :  { %2700 = vmatprep.subr.bf16.mxu0 %v3626_v15  ;;  %2786 = vmatprep.subr.bf16.mxu1 %v3628_v19 }
 0x2bb   :  { %2701 = vmatpush1.bf16.msra.mxu0 %v3625_v17  ;;  %2787 = vmatpush1.bf16.msra.mxu1 %v3627_v18 }
 0x2bc   :  { %2702 = vmatprep.subr.bf16.mxu0 %v3634_v23  ;;  %2788 = vmatprep.subr.bf16.mxu1 %v3636_v30 }
 0x2bf   :  { %2703 = vmatpush1.bf16.msra.mxu0 %v3633_v28  ;;  %2789 = vmatpush1.bf16.msra.mxu1 %v3635_v29 }
 0x2c0   :  { %2704 = vmatprep.subr.bf16.mxu0 %v3642_v34  ;;  %2790 = vmatprep.subr.bf16.mxu1 %v3644_v38 }
 0x2c3   :  { %2705 = vmatpush1.bf16.msra.mxu0 %v3641_v36  ;;  %2791 = vmatpush1.bf16.msra.mxu1 %v3643_v37 }
 0x2c4   :  { %2706 = vmatprep.subr.bf16.mxu0 %v3650_v42  ;;  %2792 = vmatprep.subr.bf16.mxu1 %v3652_v46 }
 0x2c7   :  { %2707 = vmatpush1.bf16.msra.mxu0 %v3649_v44  ;;  %2793 = vmatpush1.bf16.msra.mxu1 %v3651_v45 }
 0x2c8   :  { %2708 = vmatprep.subr.bf16.mxu0 %v3658_v50  ;;  %2794 = vmatprep.subr.bf16.mxu1 %v3660_v54 }
 0x2cb   :  { %2709 = vmatpush1.bf16.msra.mxu0 %v3657_v52  ;;  %2795 = vmatpush1.bf16.msra.mxu1 %v3659_v53 }
 0x2cc   :  { %2710 = vmatprep.subr.bf16.mxu0 %v3666_v58  ;;  %2796 = vmatprep.subr.bf16.mxu1 %v3668_v62 }
 0x2cf   :  { %2711 = vmatpush1.bf16.msra.mxu0 %v3665_v60  ;;  %2797 = vmatpush1.bf16.msra.mxu1 %v3667_v61 }
 0x2d0   :  { %2723 = vmatprep.subr.bf16.mxu0 %v3674_v2  ;;  %2809 = vmatprep.subr.bf16.mxu1 %v3676_v6 }
 0x365   :  { %v908_v7 = vpop.f32.mrb[4].mxu0  ;;  %v951_v8 = vpop.f32.mrb[4].mxu1 }
 0x366   :  { %v910_v9 = vpop.f32.mrb[5].mxu0  ;;  %v953_v10 = vpop.f32.mrb[5].mxu1 }
 0x367   :  { %v912_v11 = vpop.f32.mrb[6].mxu0  ;;  %v955_v12 = vpop.f32.mrb[6].mxu1 }
 0x368   :  { %v962_v13 = vadd.f32 %v912_v11, %v908_v7  ;;  %v976_v14 = vadd.f32 %v955_v12, %v951_v8  ;;  %v914_v15 = vpop.f32.mrb[7].mxu0  ;;  %v957_v16 = vpop.f32.mrb[7].mxu1 }
 0x369   :  { %v969_v17 = vadd.f32 %v914_v15, %v910_v9  ;;  %v983_v18 = vadd.f32 %v957_v16, %v953_v10 }
 0x36a   :  { %v963_v19 = vrot.slane %v962_v13, 4  ;;  %v977_v20 = vrot.slane %v976_v14, 4 }
 0x36b   :  { %v970_v21 = vrot.slane %v969_v17, 4  ;;  %v984_v22 = vrot.slane %v983_v18, 4 }
 0x36c   :  { %v964_v23 = vadd.f32 %v963_v19, %v962_v13  ;;  %v978_v26 = vadd.f32 %v977_v20, %v976_v14 }
 0x36d   :  { %v971_v28 = vadd.f32 %v970_v21, %v969_v17  ;;  %v985_v29 = vadd.f32 %v984_v22, %v983_v18 }
 0x36e   :  { %v965_v30 = vrot.slane %v964_v23, 2  ;;  %v979_v31 = vrot.slane %v978_v26, 2 }
 0x36f   :  { %v972_v32 = vrot.slane %v971_v28, 2  ;;  %v986_v33 = vrot.slane %v985_v29, 2 }
 0x370   :  { %v966_v34 = vadd.f32 %v965_v30, %v964_v23  ;;  %v980_v35 = vadd.f32 %v979_v31, %v978_v26 }
 0x371   :  { %v973_v36 = vadd.f32 %v972_v32, %v971_v28  ;;  %v987_v37 = vadd.f32 %v986_v33, %v985_v29 }
 0x372   :  { %v967_v38 = vrot.slane %v966_v34, 1  ;;  %v981_v39 = vrot.slane %v980_v35, 1 }
 0x373   :  { %v974_v40 = vrot.slane %v973_v36, 1  ;;  %v988_v41 = vrot.slane %v987_v37, 1 }
 0x374   :  { %v968_v42 = vadd.f32 %v967_v38, %v966_v34  ;;  %v982_v43 = vadd.f32 %v981_v39, %v980_v35 }
 0x375   :  { %v975_v44 = vadd.f32 %v974_v40, %v973_v36  ;;  %v989_v45 = vadd.f32 %v988_v41, %v987_v37 }
 0x376   :  { %v990_v46 = vmul.f32 0.0625, %v968_v42  ;;  %v992_v47 = vmul.f32 0.0625, %v982_v43 }
 0x377   :  { %v991_v48 = vmul.f32 0.0625, %v975_v44  ;;  %v993_v49 = vmul.f32 0.0625, %v989_v45 }
 0x378   :  { %v4431_v50 = vsub.f32 %v908_v7, %v990_v46  ;;  %v4433_v51 = vsub.f32 %v912_v11, %v990_v46  ;;  %v4435_v52 = vsub.f32 %v951_v8, %v992_v47  ;;  %v4437_v53 = vsub.f32 %v955_v12, %v992_v47  ;;  %v960_v47 = vld [vmem:[%s4674_s7] sm:$0xf] }
 0x379   :  { %v4439_v54 = vsub.f32 %v910_v9, %v991_v48  ;;  %v4441_v55 = vsub.f32 %v914_v15, %v991_v48  ;;  %v4443_v56 = vsub.f32 %v953_v10, %v993_v49  ;;  %v4445_v57 = vsub.f32 %v957_v16, %v993_v49  ;;  %v961_v49 = vld [vmem:[%s4675_s8] sm:$0xf] }
 0x37a   :  { %v1002_v58 = vmul.f32 %v4431_v50, %v4431_v50  ;;  %v1006_v59 = vmul.f32 %v4433_v51, %v4433_v51  ;;  %v1004_v60 = vmul.f32 %v4435_v52, %v4435_v52  ;;  %v1008_v61 = vmul.f32 %v4437_v53, %v4437_v53 }
 0x37b   :  { %v1003_v62 = vmul.f32 %v4439_v54, %v4439_v54  ;;  %v1007_v2 = vmul.f32 %v4441_v55, %v4441_v55  ;;  %v1005_v6 = vmul.f32 %v4443_v56, %v4443_v56  ;;  %v1009_v7 = vmul.f32 %v4445_v57, %v4445_v57 }
 0x37c   :  { %v1010_v8 = vadd.f32 %v1006_v59, %v1002_v58  ;;  %v1024_v9 = vadd.f32 %v1008_v61, %v1004_v60  ;;  %v4467_v48 = vsub.s32 2, %v4400_v24  ;;  %v4473_v58 = vsub.s32 3, %v4400_v24  ;;  %v4476_v60 = vld [vmem:[#allocation13 + $0x440] sm:$0xff] }
 0x37d   :  { %v1017_v10 = vadd.f32 %v1007_v2, %v1003_v62  ;;  %v1031_v11 = vadd.f32 %v1009_v7, %v1005_v6  ;;  %v1062_v59 = vrot.slane %v960_v47, %v4403_v25  ;;  %v4478_v61 = vld [vmem:[#allocation13 + $0x460] sm:$0xff]  ;;  %v1091_v2 = vrot.slane %v961_v49, %v4403_v25 }
 0x37e   :  { %v1011_v12 = vrot.slane %v1010_v8, 4  ;;  %v1025_v13 = vrot.slane %v1024_v9, 4  ;;  %v1070_v6 = vrot.slane %v960_v47, %v4467_v48  ;;  %v1099_v7 = vrot.slane %v961_v49, %v4467_v48 }
 0x37f   :  { %v1018_v14 = vrot.slane %v1017_v10, 4  ;;  %v1032_v15 = vrot.slane %v1031_v11, 4 }
 0x380   :  { %v1012_v16 = vadd.f32 %v1011_v12, %v1010_v8  ;;  %v1026_v17 = vadd.f32 %v1025_v13, %v1024_v9  ;;  %v1066_v8 = vrot.slane %v960_v47, %v4409_v27  ;;  %v1095_v12 = vrot.slane %v961_v49, %v4409_v27 }
 0x381   :  { %v1019_v18 = vadd.f32 %v1018_v14, %v1017_v10  ;;  %v1033_v19 = vadd.f32 %v1032_v15, %v1031_v11  ;;  %v1074_v13 = vrot.slane %v960_v47, %v4473_v58 }
 0x382   :  { %v1013_v20 = vrot.slane %v1012_v16, 2  ;;  %v1027_v21 = vrot.slane %v1026_v17, 2 }
 0x383   :  { %v1020_v22 = vrot.slane %v1019_v18, 2  ;;  %v1034_v23 = vrot.slane %v1033_v19, 2 }
 0x384   :  { %v1014_v26 = vadd.f32 %v1013_v20, %v1012_v16  ;;  %v1028_v28 = vadd.f32 %v1027_v21, %v1026_v17  ;;  %v1103_v17 = vrot.slane %v961_v49, %v4473_v58 }
 0x385   :  { %v1021_v29 = vadd.f32 %v1020_v22, %v1019_v18  ;;  %v1035_v30 = vadd.f32 %v1034_v23, %v1033_v19  ;;  %v3682_v18 = vcombine.high %v4476_v60, %v4478_v61 }
 0x386   :  { %v1015_v31 = vrot.slane %v1014_v26, 1  ;;  %v1029_v32 = vrot.slane %v1028_v28, 1 }
 0x387   :  { %v1022_v33 = vrot.slane %v1021_v29, 1  ;;  %v1036_v34 = vrot.slane %v1035_v30, 1 }
 0x388   :  { %v1016_v35 = vadd.f32 %v1015_v31, %v1014_v26  ;;  %v1030_v36 = vadd.f32 %v1029_v32, %v1028_v28 }
 0x389   :  { %v1023_v37 = vadd.f32 %v1022_v33, %v1021_v29  ;;  %v1037_v38 = vadd.f32 %v1036_v34, %v1035_v30 }
 0x38a   :  { %v1038_v39 = vmul.f32 0.0625, %v1016_v35  ;;  %v1040_v40 = vmul.f32 0.0625, %v1030_v36 }
 0x38b   :  { %v1039_v41 = vmul.f32 0.0625, %v1023_v37  ;;  %v1041_v42 = vmul.f32 0.0625, %v1037_v38 }
 0x38c   :  { %v1042_v43 = vadd.f32 0.8, %v1038_v39  ;;  %v1044_v44 = vadd.f32 0.8, %v1040_v40 }
 0x38d   :  { %v1043_v45 = vadd.f32 0.8, %v1039_v41  ;;  %v1045_v46 = vadd.f32 0.8, %v1041_v42 }
 0x38e   :  { %4013 = vrsqrt.f32 %v1042_v43 }
 0x38f   :  { %4015 = vrsqrt.f32 %v1044_v44 }
 0x390   :  { %4017 = vrsqrt.f32 %v1043_v45  ;;  %v1281_v45 = vld [vmem:[#allocation13 + $0x448] sm:$0xff] }
 0x391   :  { %4019 = vrsqrt.f32 %v1045_v46  ;;  %v1285_v46 = vld [vmem:[#allocation13 + $0x468] sm:$0xff] }
 0x398   :  { %v4014_v62 = vpop.eup %4013 }
 0x399   :  { %v4016_v9 = vpop.eup %4015  ;;  %v1050_v10 = vmul.f32 %v4014_v62, %v4431_v50  ;;  %v1054_v11 = vmul.f32 %v4014_v62, %v4433_v51 }
 0x39a   :  { %v4018_v14 = vpop.eup %4017  ;;  %v1052_v15 = vmul.f32 %v4016_v9, %v4435_v52  ;;  %v1056_v16 = vmul.f32 %v4016_v9, %v4437_v53  ;;  %v3684_v9 = vcombine.high %v1281_v45, %v1285_v46 }
 0x39b   :  { %v4020_v19 = vpop.eup %4019  ;;  %v1079_v20 = vmul.f32 %v1062_v59, %v1050_v10  ;;  %v1083_v21 = vmul.f32 %v1062_v59, %v1054_v11  ;;  %v1051_v50 = vmul.f32 %v4018_v14, %v4439_v54  ;;  %v1055_v51 = vmul.f32 %v4018_v14, %v4441_v55  ;;  %v1292_v10 = vld [vmem:[#allocation13 + $0x4a0] sm:$0xff]  ;;  %v1289_v11 = vld [vmem:[#allocation13 + $0x488] sm:$0xff] }
 0x39c   :  { %v1081_v22 = vmul.f32 %v1070_v6, %v1052_v15  ;;  %v1085_v23 = vmul.f32 %v1070_v6, %v1056_v16  ;;  %v1053_v26 = vmul.f32 %v4020_v19, %v4443_v56  ;;  %v1057_v52 = vmul.f32 %v4020_v19, %v4445_v57  ;;  %v1288_v6 = vld [vmem:[#allocation13 + $0x480] sm:$0xff] }
 0x39d   :  { %v1108_v28 = vadd.f32 %v1091_v2, %v1079_v20  ;;  %v1112_v53 = vadd.f32 %v1091_v2, %v1083_v21  ;;  %v1080_v29 = vmul.f32 %v1066_v8, %v1051_v50  ;;  %v1084_v30 = vmul.f32 %v1066_v8, %v1055_v51  ;;  %v1296_v21 = vld [vmem:[#allocation13 + $0x4c0] sm:$0xff] }
 0x39e   :  { %v1110_v31 = vadd.f32 %v1099_v7, %v1081_v22  ;;  %v1114_v32 = vadd.f32 %v1099_v7, %v1085_v23  ;;  %v1082_v33 = vmul.f32 %v1074_v13, %v1053_v26  ;;  %v1086_v34 = vmul.f32 %v1074_v13, %v1057_v52  ;;  %v1304_v51 = vld [vmem:[#allocation13 + $0x500] sm:$0xff]  ;;  %v1305_v23 = vld [vmem:[#allocation13 + $0x508] sm:$0xff] }
 0x39f   :  { %v1128_v35 = vmul.f32 0.2, %v1112_v53  ;;  %v1109_v36 = vadd.f32 %v1095_v12, %v1080_v29  ;;  %v1113_v37 = vadd.f32 %v1095_v12, %v1084_v30  ;;  %vm1116_vm7 = vcmp.gt.f32.partialorder %v1108_v28, 0.0  ;;  %v1293_v12 = vld [vmem:[#allocation13 + $0x4a8] sm:$0xff]  ;;  %v1308_v22 = vld [vmem:[#allocation13 + $0x520] sm:$0xff] }
 0x3a0   :  { %v1130_v54 = vmul.f32 0.2, %v1114_v32  ;;  %v1111_v55 = vadd.f32 %v1103_v17, %v1082_v33  ;;  %v1115_v38 = vadd.f32 %v1103_v17, %v1086_v34  ;;  %vm1120_vm8 = vcmp.gt.f32.partialorder %v1112_v53, 0.0  ;;  %v1309_v26 = vld [vmem:[#allocation13 + $0x528] sm:$0xff] }
 0x3a1   :  { %v1129_v39 = vmul.f32 0.2, %v1113_v37  ;;  %vm1117_vm9 = vcmp.gt.f32.partialorder %v1109_v36, 0.0  ;;  %vm1121_vm10 = vcmp.gt.f32.partialorder %v1113_v37, 0.0  ;;  %v1125_v56 = vmul.f32 0.2, %v1109_v36 }
 0x3a2   :  { %v1131_v57 = vmul.f32 0.2, %v1115_v38  ;;  %v1124_v40 = vmul.f32 0.2, %v1108_v28  ;;  %v1136_v41 = vsel %vm1120_vm8, %v1112_v53, %v1128_v35  ;;  %vm1119_vm11 = vcmp.gt.f32.partialorder %v1111_v55, 0.0  ;;  %v1316_v53 = vld [vmem:[#allocation13 + $0x560] sm:$0xff] }
 0x3a3   :  { %v1133_v42 = vsel %vm1117_vm9, %v1109_v36, %v1125_v56  ;;  %v1137_v43 = vsel %vm1121_vm10, %v1113_v37, %v1129_v39  ;;  %vm1123_vm12 = vcmp.gt.f32.partialorder %v1115_v38, 0.0  ;;  %v1127_v44 = vmul.f32 0.2, %v1111_v55  ;;  %v1313_v29 = vld [vmem:[#allocation13 + $0x548] sm:$0xff]  ;;  %v1320_v35 = vld [vmem:[#allocation13 + $0x580] sm:$0xff] }
 0x3a4   :  { %v4497_v47 = vpack.c.bf16 %v1137_v43, %v1133_v42  ;;  %v1132_v49 = vsel %vm1116_vm7, %v1108_v28, %v1124_v40  ;;  %v1139_v59 = vsel %vm1123_vm12, %v1115_v38, %v1131_v57  ;;  %vm1118_vm13 = vcmp.gt.f32.partialorder %v1110_v31, 0.0  ;;  %v1312_v28 = vld [vmem:[#allocation13 + $0x540] sm:$0xff]  ;;  %v1317_v30 = vld [vmem:[#allocation13 + $0x568] sm:$0xff] }
 0x3a5   :  { %v4500_v62 = vpack.c.bf16 %v1136_v41, %v1132_v49  ;;  %v1135_v2 = vsel %vm1119_vm11, %v1111_v55, %v1127_v44  ;;  %vm1122_vm14 = vcmp.gt.f32.partialorder %v1114_v32, 0.0  ;;  %v1126_v7 = vmul.f32 0.2, %v1110_v31  ;;  %v1324_v36 = vld [vmem:[#allocation13 + $0x5a0] sm:$0xff]  ;;  %v1321_v37 = vld [vmem:[#allocation13 + $0x588] sm:$0xff] }
 0x3a6   :  { %2712 = vmatprep.mubr.bf16.mxu0 %v4497_v47  ;;  %2798 = vmatprep.mubr.bf16.mxu1 %v4497_v47  ;;  %v4504_v8 = vpack.c.bf16 %v1139_v59, %v1135_v2  ;;  %v1138_v13 = vsel %vm1122_vm14, %v1114_v32, %v1130_v54  ;;  %v3681_v15 = vcombine.low %v4476_v60, %v4478_v61  ;;  %v1325_v54 = vld [vmem:[#allocation13 + $0x5a8] sm:$0xff]  ;;  %v1328_v57 = vld [vmem:[#allocation13 + $0x5c0] sm:$0xff] }
 0x3a7   :  { %2713 = vmatmul.mubr.bf16.vlgmr.msra.gmra.mrb[8].mxu0 %v4500_v62  ;;  %2799 = vmatmul.mubr.bf16.vlgmr.msra.gmra.mrb[8].mxu1 %v4500_v62  ;;  %v1134_v14 = vsel %vm1118_vm13, %v1110_v31, %v1126_v7  ;;  %v3683_v16 = vcombine.low %v1281_v45, %v1285_v46  ;;  %v3690_v19 = vcombine.high %v1288_v6, %v1292_v10  ;;  %v1332_v40 = vld [vmem:[#allocation13 + $0x5e0] sm:$0xff]  ;;  %v1329_v41 = vld [vmem:[#allocation13 + $0x5c8] sm:$0xff] }
 0x3a8   :  { %2724 = vmatpush1.bf16.msra.mxu0 %v3673_v4  ;;  %2810 = vmatpush1.bf16.msra.mxu1 %v3675_v5  ;;  %v4517_v17 = vpack.c.bf16 %v1138_v13, %v1134_v14  ;;  %v3692_v20 = vcombine.high %v1289_v11, %v1293_v12  ;;  %v3689_v3 = vcombine.low %v1288_v6, %v1292_v10  ;;  %v1333_v42 = vld [vmem:[#allocation13 + $0x5e8] sm:$0xff]  ;;  %v1336_v49 = vld [vmem:[#allocation13 + $0x600] sm:$0xff] }
 0x3a9   :  { %2755 = vmatprep.mubr.bf16.mxu0 %v4504_v8  ;;  %2841 = vmatprep.mubr.bf16.mxu1 %v4504_v8  ;;  %v3691_v4 = vcombine.low %v1289_v11, %v1293_v12  ;;  %v3698_v5 = vcombine.high %v1296_v21, %v1300_v63  ;;  %v3700_v50 = vcombine.high %v1297_v0, %v1301_v1  ;;  %v1340_v59 = vld [vmem:[#allocation13 + $0x620] sm:$0xff]  ;;  %v1337_v2 = vld [vmem:[#allocation13 + $0x608] sm:$0xff] }
 0x3aa   :  { %2725 = vmatprep.subr.bf16.mxu0 %v3682_v18  ;;  %2811 = vmatprep.subr.bf16.mxu1 %v3684_v9  ;;  %v3697_v60 = vcombine.low %v1296_v21, %v1300_v63  ;;  %v3699_v61 = vcombine.low %v1297_v0, %v1301_v1  ;;  %v3706_v18 = vcombine.high %v1304_v51, %v1308_v22  ;;  %v1341_v6 = vld [vmem:[#allocation13 + $0x628] sm:$0xff]  ;;  %v1344_v12 = vld [vmem:[#allocation13 + $0x640] sm:$0xff] }
 0x3ab   :  { %v3708_v52 = vcombine.high %v1305_v23, %v1309_v26  ;;  %v3705_v31 = vcombine.low %v1304_v51, %v1308_v22  ;;  %v3707_v32 = vcombine.low %v1305_v23, %v1309_v26  ;;  %v3714_v33 = vcombine.high %v1312_v28, %v1316_v53  ;;  %v1348_v13 = vld [vmem:[#allocation13 + $0x660] sm:$0xff]  ;;  %v1345_v14 = vld [vmem:[#allocation13 + $0x648] sm:$0xff] }
 0x3ac   :  { %2726 = vmatpush1.bf16.msra.mxu0 %v3681_v15  ;;  %2812 = vmatpush1.bf16.msra.mxu1 %v3683_v16  ;;  %v3716_v34 = vcombine.high %v1313_v29, %v1317_v30  ;;  %v3713_v55 = vcombine.low %v1312_v28, %v1316_v53  ;;  %v3715_v38 = vcombine.low %v1313_v29, %v1317_v30  ;;  %v1349_v15 = vld [vmem:[#allocation13 + $0x668] sm:$0xff]  ;;  %v1352_v63 = vld [vmem:[#allocation13 + $0x680] sm:$0xff] }
 0x3ad   :  { %2727 = vmatprep.subr.bf16.mxu0 %v3690_v19  ;;  %2813 = vmatprep.subr.bf16.mxu1 %v3692_v20  ;;  %v3722_v39 = vcombine.high %v1320_v35, %v1324_v36  ;;  %v3724_v56 = vcombine.high %v1321_v37, %v1325_v54  ;;  %v3721_v43 = vcombine.low %v1320_v35, %v1324_v36  ;;  %v1356_v0 = vld [vmem:[#allocation13 + $0x6a0] sm:$0xff]  ;;  %v1353_v1 = vld [vmem:[#allocation13 + $0x688] sm:$0xff] }
 0x3ae   :  { %v3723_v44 = vcombine.low %v1321_v37, %v1325_v54  ;;  %v3730_v45 = vcombine.high %v1328_v57, %v1332_v40  ;;  %v3732_v46 = vcombine.high %v1329_v41, %v1333_v42  ;;  %v3729_v7 = vcombine.low %v1328_v57, %v1332_v40  ;;  %v1360_v22 = vld [vmem:[#allocation13 + $0x6c0] sm:$0xff]  ;;  %v1361_v26 = vld [vmem:[#allocation13 + $0x6c8] sm:$0xff] }
 0x3af   :  { %v3731_v9 = vcombine.low %v1329_v41, %v1333_v42  ;;  %v3738_v10 = vcombine.high %v1336_v49, %v1340_v59  ;;  %v3740_v11 = vcombine.high %v1337_v2, %v1341_v6  ;;  %v3737_v16 = vcombine.low %v1336_v49, %v1340_v59  ;;  %v1364_v23 = vld [vmem:[#allocation13 + $0x6e0] sm:$0xff]  ;;  %v1369_v30 = vld [vmem:[#allocation13 + $0x708] sm:$0xff] }
 0x3b0   :  { %2728 = vmatpush1.bf16.msra.mxu0 %v3689_v3  ;;  %2814 = vmatpush1.bf16.msra.mxu1 %v3691_v4  ;;  %v3739_v19 = vcombine.low %v1337_v2, %v1341_v6  ;;  %v3746_v20 = vcombine.high %v1344_v12, %v1348_v13  ;;  %v3748_v21 = vcombine.high %v1345_v14, %v1349_v15  ;;  %v1357_v3 = vld [vmem:[#allocation13 + $0x6a8] sm:$0xff]  ;;  %v1368_v53 = vld [vmem:[#allocation13 + $0x700] sm:$0xff] }
 0x3b1   :  { %2729 = vmatprep.subr.bf16.mxu0 %v3698_v5  ;;  %2815 = vmatprep.subr.bf16.mxu1 %v3700_v50  ;;  %v3745_v4 = vcombine.low %v1344_v12, %v1348_v13  ;;  %v3747_v5 = vcombine.low %v1345_v14, %v1349_v15  ;;  %v3754_v50 = vcombine.high %v1352_v63, %v1356_v0  ;;  %v1372_v29 = vld [vmem:[#allocation13 + $0x720] sm:$0xff]  ;;  %v1377_v54 = vld [vmem:[#allocation13 + $0x748] sm:$0xff]  ;;  %v1146_v13 = vld [vmem:[#allocation13 + $0x10] sm:$0xff] }
 0x3b2   :  { %v3756_v51 = vcombine.high %v1353_v1, %v1357_v3  ;;  %v1376_v36 = vld [vmem:[#allocation13 + $0x740] sm:$0xff]  ;;  %v1385_v42 = vld [vmem:[#allocation13 + $0x788] sm:$0xff]  ;;  %v1150_v14 = vld [vmem:[#allocation13 + $0x30] sm:$0xff] }
 0x3b3   :  { %v1380_v37 = vld [vmem:[#allocation13 + $0x760] sm:$0xff]  ;;  %v1393_v6 = vld [vmem:[#allocation13 + $0x7c8] sm:$0xff]  ;;  %v1147_v15 = vld [vmem:[#allocation13 + $0x18] sm:$0xff] }
 0x3b4   :  { %2730 = vmatpush1.bf16.msra.mxu0 %v3697_v60  ;;  %2816 = vmatpush1.bf16.msra.mxu1 %v3699_v61  ;;  %v1365_v60 = vld [vmem:[#allocation13 + $0x6e8] sm:$0xff]  ;;  %v3753_v61 = vcombine.low %v1352_v63, %v1356_v0  ;;  %v1384_v40 = vld [vmem:[#allocation13 + $0x780] sm:$0xff]  ;;  %v1154_v0 = vld [vmem:[#allocation13 + $0x50] sm:$0xff] }
 0x3b5   :  { %2731 = vmatprep.subr.bf16.mxu0 %v3706_v18  ;;  %2817 = vmatprep.subr.bf16.mxu1 %v3708_v52  ;;  %v3755_v18 = vcombine.low %v1353_v1, %v1357_v3  ;;  %v3762_v52 = vcombine.high %v1360_v22, %v1364_v23  ;;  %v3764_v28 = vcombine.high %v1361_v26, %v1365_v60  ;;  %v1388_v41 = vld [vmem:[#allocation13 + $0x7a0] sm:$0xff]  ;;  %v1158_v1 = vld [vmem:[#allocation13 + $0x70] sm:$0xff]  ;;  %v1155_v3 = vld [vmem:[#allocation13 + $0x58] sm:$0xff] }
 0x3b6   :  { %v1392_v59 = vld [vmem:[#allocation13 + $0x7c0] sm:$0xff] }
 0x3b7   :  { %v1396_v2 = vld [vmem:[#allocation13 + $0x7e0] sm:$0xff] }
 0x3b8   :  { %2732 = vmatpush1.bf16.msra.mxu0 %v3705_v31  ;;  %2818 = vmatpush1.bf16.msra.mxu1 %v3707_v32  ;;  %v1373_v31 = vld [vmem:[#allocation13 + $0x728] sm:$0xff]  ;;  %v3761_v32 = vcombine.low %v1360_v22, %v1364_v23  ;;  %v1162_v23 = vld [vmem:[#allocation13 + $0x90] sm:$0xff] }
 0x3b9   :  { %2733 = vmatprep.subr.bf16.mxu0 %v3714_v33  ;;  %2819 = vmatprep.subr.bf16.mxu1 %v3716_v34  ;;  %v3763_v33 = vcombine.low %v1361_v26, %v1365_v60  ;;  %v3770_v34 = vcombine.high %v1368_v53, %v1372_v29  ;;  %v3772_v35 = vcombine.high %v1369_v30, %v1373_v31  ;;  %v1166_v26 = vld [vmem:[#allocation13 + $0xb0] sm:$0xff]  ;;  %v1163_v60 = vld [vmem:[#allocation13 + $0x98] sm:$0xff] }
 0x3bc   :  { %2734 = vmatpush1.bf16.msra.mxu0 %v3713_v55  ;;  %2820 = vmatpush1.bf16.msra.mxu1 %v3715_v38  ;;  %v1381_v55 = vld [vmem:[#allocation13 + $0x768] sm:$0xff]  ;;  %v3769_v38 = vcombine.low %v1368_v53, %v1372_v29  ;;  %v1170_v29 = vld [vmem:[#allocation13 + $0xd0] sm:$0xff] }
 0x3bd   :  { %2735 = vmatprep.subr.bf16.mxu0 %v3722_v39  ;;  %2821 = vmatprep.subr.bf16.mxu1 %v3724_v56  ;;  %v3771_v39 = vcombine.low %v1369_v30, %v1373_v31  ;;  %v3778_v56 = vcombine.high %v1376_v36, %v1380_v37  ;;  %v3780_v57 = vcombine.high %v1377_v54, %v1381_v55  ;;  %v1174_v30 = vld [vmem:[#allocation13 + $0xf0] sm:$0xff]  ;;  %v1171_v31 = vld [vmem:[#allocation13 + $0xd8] sm:$0xff] }
 0x3c0   :  { %2736 = vmatpush1.bf16.msra.mxu0 %v3721_v43  ;;  %2822 = vmatpush1.bf16.msra.mxu1 %v3723_v44  ;;  %v1389_v43 = vld [vmem:[#allocation13 + $0x7a8] sm:$0xff]  ;;  %v3777_v44 = vcombine.low %v1376_v36, %v1380_v37  ;;  %v1178_v37 = vld [vmem:[#allocation13 + $0x110] sm:$0xff] }
 0x3c1   :  { %2737 = vmatprep.subr.bf16.mxu0 %v3730_v45  ;;  %2823 = vmatprep.subr.bf16.mxu1 %v3732_v46  ;;  %v3779_v45 = vcombine.low %v1377_v54, %v1381_v55  ;;  %v3786_v46 = vcombine.high %v1384_v40, %v1388_v41  ;;  %v3788_v49 = vcombine.high %v1385_v42, %v1389_v43  ;;  %v1182_v54 = vld [vmem:[#allocation13 + $0x130] sm:$0xff]  ;;  %v1183_v55 = vld [vmem:[#allocation13 + $0x138] sm:$0xff] }
 0x3c4   :  { %2738 = vmatpush1.bf16.msra.mxu0 %v3729_v7  ;;  %2824 = vmatpush1.bf16.msra.mxu1 %v3731_v9  ;;  %v1397_v7 = vld [vmem:[#allocation13 + $0x7e8] sm:$0xff]  ;;  %v3785_v9 = vcombine.low %v1384_v40, %v1388_v41  ;;  %v1186_v40 = vld [vmem:[#allocation13 + $0x150] sm:$0xff] }
 0x3c5   :  { %2739 = vmatprep.subr.bf16.mxu0 %v3738_v10  ;;  %2825 = vmatprep.subr.bf16.mxu1 %v3740_v11  ;;  %v3787_v10 = vcombine.low %v1385_v42, %v1389_v43  ;;  %v3794_v11 = vcombine.high %v1392_v59, %v1396_v2  ;;  %v3796_v12 = vcombine.high %v1393_v6, %v1397_v7  ;;  %v1190_v41 = vld [vmem:[#allocation13 + $0x170] sm:$0xff]  ;;  %v1187_v42 = vld [vmem:[#allocation13 + $0x158] sm:$0xff] }
 0x3c6   :  { %v1191_v43 = vld [vmem:[#allocation13 + $0x178] sm:$0xff] }
 0x3c8   :  { %2740 = vmatpush1.bf16.msra.mxu0 %v3737_v16  ;;  %2826 = vmatpush1.bf16.msra.mxu1 %v3739_v19  ;;  %v1151_v16 = vld [vmem:[#allocation13 + $0x38] sm:$0xff]  ;;  %v3793_v19 = vcombine.low %v1392_v59, %v1396_v2  ;;  %v1194_v59 = vld [vmem:[#allocation13 + $0x190] sm:$0xff] }
 0x3c9   :  { %2741 = vmatprep.subr.bf16.mxu0 %v3746_v20  ;;  %2827 = vmatprep.subr.bf16.mxu1 %v3748_v21  ;;  %v3795_v20 = vcombine.low %v1393_v6, %v1397_v7  ;;  %v3550_v21 = vcombine.high %v1146_v13, %v1150_v14  ;;  %v3552_v63 = vcombine.high %v1147_v15, %v1151_v16  ;;  %v1198_v2 = vld [vmem:[#allocation13 + $0x1b0] sm:$0xff]  ;;  %v1195_v6 = vld [vmem:[#allocation13 + $0x198] sm:$0xff] }
 0x3ca   :  { %v1199_v7 = vld [vmem:[#allocation13 + $0x1b8] sm:$0xff] }
 0x3cc   :  { %2742 = vmatpush1.bf16.msra.mxu0 %v3745_v4  ;;  %2828 = vmatpush1.bf16.msra.mxu1 %v3747_v5  ;;  %v1159_v4 = vld [vmem:[#allocation13 + $0x78] sm:$0xff]  ;;  %v3549_v5 = vcombine.low %v1146_v13, %v1150_v14  ;;  %v1202_v13 = vld [vmem:[#allocation13 + $0x1d0] sm:$0xff] }
 0x3cd   :  { %2743 = vmatprep.subr.bf16.mxu0 %v3754_v50  ;;  %2829 = vmatprep.subr.bf16.mxu1 %v3756_v51  ;;  %v3551_v50 = vcombine.low %v1147_v15, %v1151_v16  ;;  %v3558_v51 = vcombine.high %v1154_v0, %v1158_v1  ;;  %v3560_v22 = vcombine.high %v1155_v3, %v1159_v4  ;;  %v1206_v14 = vld [vmem:[#allocation13 + $0x1f0] sm:$0xff]  ;;  %v1203_v15 = vld [vmem:[#allocation13 + $0x1d8] sm:$0xff] }
 0x3ce   :  { %v1207_v16 = vld [vmem:[#allocation13 + $0x1f8] sm:$0xff] }
 0x3d0   :  { %2744 = vmatpush1.bf16.msra.mxu0 %v3753_v61  ;;  %2830 = vmatpush1.bf16.msra.mxu1 %v3755_v18  ;;  %v1167_v61 = vld [vmem:[#allocation13 + $0xb8] sm:$0xff]  ;;  %v3557_v18 = vcombine.low %v1154_v0, %v1158_v1  ;;  %v1210_v0 = vld [vmem:[#allocation13 + $0x210] sm:$0xff] }
 0x3d1   :  { %2745 = vmatprep.subr.bf16.mxu0 %v3762_v52  ;;  %2831 = vmatprep.subr.bf16.mxu1 %v3764_v28  ;;  %v3559_v52 = vcombine.low %v1155_v3, %v1159_v4  ;;  %v3566_v28 = vcombine.high %v1162_v23, %v1166_v26  ;;  %v3568_v53 = vcombine.high %v1163_v60, %v1167_v61  ;;  %v1214_v1 = vld [vmem:[#allocation13 + $0x230] sm:$0xff]  ;;  %v1211_v3 = vld [vmem:[#allocation13 + $0x218] sm:$0xff] }
 0x3d2   :  { %v1215_v4 = vld [vmem:[#allocation13 + $0x238] sm:$0xff] }
 0x3d4   :  { %2746 = vmatpush1.bf16.msra.mxu0 %v3761_v32  ;;  %2832 = vmatpush1.bf16.msra.mxu1 %v3763_v33  ;;  %v1175_v32 = vld [vmem:[#allocation13 + $0xf8] sm:$0xff]  ;;  %v3565_v33 = vcombine.low %v1162_v23, %v1166_v26  ;;  %v1218_v23 = vld [vmem:[#allocation13 + $0x250] sm:$0xff] }
 0x3d5   :  { %2747 = vmatprep.subr.bf16.mxu0 %v3770_v34  ;;  %2833 = vmatprep.subr.bf16.mxu1 %v3772_v35  ;;  %v3567_v34 = vcombine.low %v1163_v60, %v1167_v61  ;;  %v3574_v35 = vcombine.high %v1170_v29, %v1174_v30  ;;  %v3576_v36 = vcombine.high %v1171_v31, %v1175_v32  ;;  %v1222_v26 = vld [vmem:[#allocation13 + $0x270] sm:$0xff]  ;;  %v1219_v60 = vld [vmem:[#allocation13 + $0x258] sm:$0xff] }
 0x3d6   :  { %v1223_v61 = vld [vmem:[#allocation13 + $0x278] sm:$0xff] }
 0x3d8   :  { %2748 = vmatpush1.bf16.msra.mxu0 %v3769_v38  ;;  %2834 = vmatpush1.bf16.msra.mxu1 %v3771_v39  ;;  %v3573_v38 = vcombine.low %v1170_v29, %v1174_v30  ;;  %v3575_v39 = vcombine.low %v1171_v31, %v1175_v32  ;;  %v1226_v29 = vld [vmem:[#allocation13 + $0x290] sm:$0xff]  ;;  %v1227_v31 = vld [vmem:[#allocation13 + $0x298] sm:$0xff] }
 0x3d9   :  { %2749 = vmatprep.subr.bf16.mxu0 %v3778_v56  ;;  %2835 = vmatprep.subr.bf16.mxu1 %v3780_v57  ;;  %v3582_v56 = vcombine.high %v1178_v37, %v1182_v54  ;;  %v1230_v30 = vld [vmem:[#allocation13 + $0x2b0] sm:$0xff]  ;;  %v1231_v32 = vld [vmem:[#allocation13 + $0x2b8] sm:$0xff] }
 0x3dc   :  { %2750 = vmatpush1.bf16.msra.mxu0 %v3777_v44  ;;  %2836 = vmatpush1.bf16.msra.mxu1 %v3779_v45  ;;  %v3581_v44 = vcombine.low %v1178_v37, %v1182_v54  ;;  %v1234_v37 = vld [vmem:[#allocation13 + $0x2d0] sm:$0xff] }
 0x3dd   :  { %2751 = vmatprep.subr.bf16.mxu0 %v3786_v46  ;;  %2837 = vmatprep.subr.bf16.mxu1 %v3788_v49  ;;  %v3590_v46 = vcombine.high %v1186_v40, %v1190_v41  ;;  %v3592_v49 = vcombine.high %v1187_v42, %v1191_v43  ;;  %v1238_v54 = vld [vmem:[#allocation13 + $0x2f0] sm:$0xff] }
 0x3e0   :  { %2752 = vmatpush1.bf16.msra.mxu0 %v3785_v9  ;;  %2838 = vmatpush1.bf16.msra.mxu1 %v3787_v10  ;;  %v3589_v9 = vcombine.low %v1186_v40, %v1190_v41  ;;  %v3591_v10 = vcombine.low %v1187_v42, %v1191_v43  ;;  %v1242_v40 = vld [vmem:[#allocation13 + $0x310] sm:$0xff]  ;;  %v1243_v42 = vld [vmem:[#allocation13 + $0x318] sm:$0xff] }
 0x3e1   :  { %2753 = vmatprep.subr.bf16.mxu0 %v3794_v11  ;;  %2839 = vmatprep.subr.bf16.mxu1 %v3796_v12  ;;  %v3598_v11 = vcombine.high %v1194_v59, %v1198_v2  ;;  %v3600_v12 = vcombine.high %v1195_v6, %v1199_v7  ;;  %v1246_v41 = vld [vmem:[#allocation13 + $0x330] sm:$0xff]  ;;  %v1247_v43 = vld [vmem:[#allocation13 + $0x338] sm:$0xff] }
 0x3e4   :  { %2754 = vmatpush1.bf16.msra.mxu0 %v3793_v19  ;;  %2840 = vmatpush1.bf16.msra.mxu1 %v3795_v20  ;;  %v3597_v19 = vcombine.low %v1194_v59, %v1198_v2  ;;  %v3599_v20 = vcombine.low %v1195_v6, %v1199_v7  ;;  %v1250_v59 = vld [vmem:[#allocation13 + $0x350] sm:$0xff]  ;;  %v1251_v6 = vld [vmem:[#allocation13 + $0x358] sm:$0xff] }
 0x3e5   :  { %2852 = vmatprep.subr.bf16.mxu0 %v3550_v21  ;;  %2938 = vmatprep.subr.bf16.mxu1 %v3552_v63  ;;  %v3606_v21 = vcombine.high %v1202_v13, %v1206_v14  ;;  %v3608_v63 = vcombine.high %v1203_v15, %v1207_v16  ;;  %v1254_v2 = vld [vmem:[#allocation13 + $0x370] sm:$0xff]  ;;  %v1255_v7 = vld [vmem:[#allocation13 + $0x378] sm:$0xff] }
 0x3e7   :  { %2756 = vmatmul.mubr.bf16.vlgmr.msra.gmra.mrb[8].mxu0 %v4517_v17  ;;  %2842 = vmatmul.mubr.bf16.vlgmr.msra.gmra.mrb[8].mxu1 %v4517_v17 }
 0x3e8   :  { %2853 = vmatpush1.bf16.msra.mxu0 %v3549_v5  ;;  %2884 = vmatprep.mubr.bf16.mxu0 %v4497_v47  ;;  %v3605_v5 = vcombine.low %v1202_v13, %v1206_v14  ;;  %v1258_v13 = vld [vmem:[#allocation13 + $0x390] sm:$0xff] }
 0x3e9   :  { %2939 = vmatpush1.bf16.msra.mxu1 %v3551_v50  ;;  %2970 = vmatprep.mubr.bf16.mxu1 %v4497_v47  ;;  %v1179_v47 = vld [vmem:[#allocation13 + $0x118] sm:$0xff]  ;;  %v3607_v50 = vcombine.low %v1203_v15, %v1207_v16  ;;  %v1262_v14 = vld [vmem:[#allocation13 + $0x3b0] sm:$0xff] }
 0x3ea   :  { %2854 = vmatprep.subr.bf16.mxu0 %v3558_v51  ;;  %2940 = vmatprep.subr.bf16.mxu1 %v3560_v22  ;;  %v3584_v57 = vcombine.high %v1179_v47, %v1183_v55  ;;  %v3583_v45 = vcombine.low %v1179_v47, %v1183_v55  ;;  %v3614_v51 = vcombine.high %v1210_v0, %v1214_v1  ;;  %v1235_v47 = vld [vmem:[#allocation13 + $0x2d8] sm:$0xff] }
 0x3eb   :  { %v3616_v22 = vcombine.high %v1211_v3, %v1215_v4  ;;  %v1239_v55 = vld [vmem:[#allocation13 + $0x2f8] sm:$0xff] }
 0x3ec   :  { %2855 = vmatpush1.bf16.msra.mxu0 %v3557_v18  ;;  %v3613_v18 = vcombine.low %v1210_v0, %v1214_v1  ;;  %v1259_v15 = vld [vmem:[#allocation13 + $0x398] sm:$0xff]  ;;  %v1266_v0 = vld [vmem:[#allocation13 + $0x3d0] sm:$0xff] }
 0x3ed   :  { %2941 = vmatpush1.bf16.msra.mxu1 %v3559_v52  ;;  %2856 = vmatprep.subr.bf16.mxu0 %v3566_v28  ;;  %v3615_v52 = vcombine.low %v1211_v3, %v1215_v4  ;;  %v3622_v28 = vcombine.high %v1218_v23, %v1222_v26  ;;  %v1263_v16 = vld [vmem:[#allocation13 + $0x3b8] sm:$0xff]  ;;  %v1270_v1 = vld [vmem:[#allocation13 + $0x3f0] sm:$0xff] }
 0x3ee   :  { %2942 = vmatprep.subr.bf16.mxu1 %v3568_v53  ;;  %v3624_v53 = vcombine.high %v1219_v60, %v1223_v61  ;;  %v1267_v3 = vld [vmem:[#allocation13 + $0x3d8] sm:$0xff] }
 0x3ef   :  { %v1271_v4 = vld [vmem:[#allocation13 + $0x3f8] sm:$0xff] }
 0x3f0   :  { %2857 = vmatpush1.bf16.msra.mxu0 %v3565_v33  ;;  %v3621_v33 = vcombine.low %v1218_v23, %v1222_v26  ;;  %v1274_v23 = vld [vmem:[#allocation13 + $0x410] sm:$0xff] }
 0x3f1   :  { %2943 = vmatpush1.bf16.msra.mxu1 %v3567_v34  ;;  %2858 = vmatprep.subr.bf16.mxu0 %v3574_v35  ;;  %v3623_v34 = vcombine.low %v1219_v60, %v1223_v61  ;;  %v3630_v35 = vcombine.high %v1226_v29, %v1230_v30  ;;  %v1278_v26 = vld [vmem:[#allocation13 + $0x430] sm:$0xff]  ;;  %v1275_v60 = vld [vmem:[#allocation13 + $0x418] sm:$0xff] }
 0x3f2   :  { %2944 = vmatprep.subr.bf16.mxu1 %v3576_v36  ;;  %v3632_v36 = vcombine.high %v1227_v31, %v1231_v32  ;;  %v1279_v61 = vld [vmem:[#allocation13 + $0x438] sm:$0xff] }
 0x3f4   :  { %2859 = vmatpush1.bf16.msra.mxu0 %v3573_v38  ;;  %v3629_v38 = vcombine.low %v1226_v29, %v1230_v30  ;;  %v1282_v29 = vld [vmem:[#allocation13 + $0x450] sm:$0xff] }
 0x3f5   :  { %2945 = vmatpush1.bf16.msra.mxu1 %v3575_v39  ;;  %2860 = vmatprep.subr.bf16.mxu0 %v3582_v56  ;;  %v3631_v39 = vcombine.low %v1227_v31, %v1231_v32  ;;  %v3638_v56 = vcombine.high %v1234_v37, %v1238_v54  ;;  %v1286_v30 = vld [vmem:[#allocation13 + $0x470] sm:$0xff]  ;;  %v3677_v31 = vcombine.low %v1274_v23, %v1278_v26  ;;  %v1283_v32 = vld [vmem:[#allocation13 + $0x458] sm:$0xff] }
 0x3f6   :  { %2946 = vmatprep.subr.bf16.mxu1 %v3584_v57  ;;  %v3640_v57 = vcombine.high %v1235_v47, %v1239_v55 }
 0x3f8   :  { %2861 = vmatpush1.bf16.msra.mxu0 %v3581_v44  ;;  %v3637_v44 = vcombine.low %v1234_v37, %v1238_v54  ;;  %v1294_v37 = vld [vmem:[#allocation13 + $0x4b0] sm:$0xff] }
 0x3f9   :  { %2947 = vmatpush1.bf16.msra.mxu1 %v3583_v45  ;;  %2862 = vmatprep.subr.bf16.mxu0 %v3590_v46  ;;  %v3639_v45 = vcombine.low %v1235_v47, %v1239_v55  ;;  %v3646_v46 = vcombine.high %v1242_v40, %v1246_v41  ;;  %v1291_v47 = vld [vmem:[#allocation13 + $0x498] sm:$0xff] }
 0x3fa   :  { %2948 = vmatprep.subr.bf16.mxu1 %v3592_v49  ;;  %v3648_v49 = vcombine.high %v1243_v42, %v1247_v43  ;;  %v1295_v55 = vld [vmem:[#allocation13 + $0x4b8] sm:$0xff] }
 0x3fc   :  { %2863 = vmatpush1.bf16.msra.mxu0 %v3589_v9  ;;  %v3645_v9 = vcombine.low %v1242_v40, %v1246_v41  ;;  %v1298_v40 = vld [vmem:[#allocation13 + $0x4d0] sm:$0xff] }
 0x3fd   :  { %2949 = vmatpush1.bf16.msra.mxu1 %v3591_v10  ;;  %2864 = vmatprep.subr.bf16.mxu0 %v3598_v11  ;;  %v3647_v10 = vcombine.low %v1243_v42, %v1247_v43  ;;  %v3654_v11 = vcombine.high %v1250_v59, %v1254_v2  ;;  %v1302_v41 = vld [vmem:[#allocation13 + $0x4f0] sm:$0xff]  ;;  %v1299_v42 = vld [vmem:[#allocation13 + $0x4d8] sm:$0xff] }
 0x3fe   :  { %2950 = vmatprep.subr.bf16.mxu1 %v3600_v12  ;;  %v3656_v12 = vcombine.high %v1251_v6, %v1255_v7  ;;  %v1303_v43 = vld [vmem:[#allocation13 + $0x4f8] sm:$0xff] }
 0x400   :  { %2865 = vmatpush1.bf16.msra.mxu0 %v3597_v19  ;;  %v3653_v19 = vcombine.low %v1250_v59, %v1254_v2  ;;  %v1310_v59 = vld [vmem:[#allocation13 + $0x530] sm:$0xff]  ;;  %v1307_v2 = vld [vmem:[#allocation13 + $0x518] sm:$0xff] }
 0x401   :  { %2951 = vmatpush1.bf16.msra.mxu1 %v3599_v20  ;;  %2866 = vmatprep.subr.bf16.mxu0 %v3606_v21  ;;  %v3655_v20 = vcombine.low %v1251_v6, %v1255_v7  ;;  %v3662_v21 = vcombine.high %v1258_v13, %v1262_v14  ;;  %v1311_v6 = vld [vmem:[#allocation13 + $0x538] sm:$0xff]  ;;  %v3703_v7 = vcombine.low %v1299_v42, %v1303_v43 }
 0x402   :  { %2952 = vmatprep.subr.bf16.mxu1 %v3608_v63  ;;  %v3664_v63 = vcombine.high %v1259_v15, %v1263_v16 }
 0x404   :  { %2867 = vmatpush1.bf16.msra.mxu0 %v3605_v5  ;;  %v3661_v5 = vcombine.low %v1258_v13, %v1262_v14  ;;  %v1315_v13 = vld [vmem:[#allocation13 + $0x558] sm:$0xff] }
 0x405   :  { %2953 = vmatpush1.bf16.msra.mxu1 %v3607_v50  ;;  %2868 = vmatprep.subr.bf16.mxu0 %v3614_v51  ;;  %v3663_v50 = vcombine.low %v1259_v15, %v1263_v16  ;;  %v3670_v51 = vcombine.high %v1266_v0, %v1270_v1  ;;  %v1319_v14 = vld [vmem:[#allocation13 + $0x578] sm:$0xff]  ;;  %v3711_v16 = vcombine.low %v1307_v2, %v1311_v6 }
 0x406   :  { %2954 = vmatprep.subr.bf16.mxu1 %v3616_v22  ;;  %v3672_v22 = vcombine.high %v1267_v3, %v1271_v4 }
 0x408   :  { %2869 = vmatpush1.bf16.msra.mxu0 %v3613_v18  ;;  %v3669_v18 = vcombine.low %v1266_v0, %v1270_v1  ;;  %v1323_v0 = vld [vmem:[#allocation13 + $0x598] sm:$0xff] }
 0x409   :  { %2955 = vmatpush1.bf16.msra.mxu1 %v3615_v52  ;;  %2870 = vmatprep.subr.bf16.mxu0 %v3622_v28  ;;  %v3671_v52 = vcombine.low %v1267_v3, %v1271_v4  ;;  %v3678_v28 = vcombine.high %v1274_v23, %v1278_v26  ;;  %v1327_v1 = vld [vmem:[#allocation13 + $0x5b8] sm:$0xff]  ;;  %v3719_v4 = vcombine.low %v1315_v13, %v1319_v14 }
 0x40a   :  { %2956 = vmatprep.subr.bf16.mxu1 %v3624_v53  ;;  %v3680_v53 = vcombine.high %v1275_v60, %v1279_v61  ;;  %v1331_v23 = vld [vmem:[#allocation13 + $0x5d8] sm:$0xff] }
 0x40b   :  { %v1335_v26 = vld [vmem:[#allocation13 + $0x5f8] sm:$0xff] }
 0x40c   :  { %2871 = vmatpush1.bf16.msra.mxu0 %v3621_v33  ;;  %v1287_v33 = vld [vmem:[#allocation13 + $0x478] sm:$0xff] }
 0x40d   :  { %2957 = vmatpush1.bf16.msra.mxu1 %v3623_v34  ;;  %2872 = vmatprep.subr.bf16.mxu0 %v3630_v35  ;;  %v3679_v34 = vcombine.low %v1275_v60, %v1279_v61  ;;  %v3686_v35 = vcombine.high %v1282_v29, %v1286_v30  ;;  %v3688_v54 = vcombine.high %v1283_v32, %v1287_v33 }
 0x40e   :  { %2958 = vmatprep.subr.bf16.mxu1 %v3632_v36  ;;  %v1290_v36 = vld [vmem:[#allocation13 + $0x490] sm:$0xff]  ;;  %v3727_v61 = vcombine.low %v1323_v0, %v1327_v1 }
 0x410   :  { %2873 = vmatpush1.bf16.msra.mxu0 %v3629_v38  ;;  %v3685_v38 = vcombine.low %v1282_v29, %v1286_v30  ;;  %v1339_v29 = vld [vmem:[#allocation13 + $0x618] sm:$0xff] }
 0x411   :  { %2959 = vmatpush1.bf16.msra.mxu1 %v3631_v39  ;;  %2874 = vmatprep.subr.bf16.mxu0 %v3638_v56  ;;  %v3687_v39 = vcombine.low %v1283_v32, %v1287_v33  ;;  %v3694_v56 = vcombine.high %v1290_v36, %v1294_v37  ;;  %v1343_v30 = vld [vmem:[#allocation13 + $0x638] sm:$0xff]  ;;  %v3735_v32 = vcombine.low %v1331_v23, %v1335_v26 }
 0x412   :  { %2960 = vmatprep.subr.bf16.mxu1 %v3640_v57  ;;  %v3696_v57 = vcombine.high %v1291_v47, %v1295_v55 }
 0x414   :  { %2875 = vmatpush1.bf16.msra.mxu0 %v3637_v44  ;;  %v3693_v44 = vcombine.low %v1290_v36, %v1294_v37  ;;  %v1350_v36 = vld [vmem:[#allocation13 + $0x670] sm:$0xff]  ;;  %v1347_v37 = vld [vmem:[#allocation13 + $0x658] sm:$0xff] }
 0x415   :  { %2961 = vmatpush1.bf16.msra.mxu1 %v3639_v45  ;;  %2876 = vmatprep.subr.bf16.mxu0 %v3646_v46  ;;  %v3702_v45 = vcombine.high %v1298_v40, %v1302_v41  ;;  %v3704_v46 = vcombine.high %v1299_v42, %v1303_v43 }
 0x416   :  { %2962 = vmatprep.subr.bf16.mxu1 %v3648_v49  ;;  %v1306_v49 = vld [vmem:[#allocation13 + $0x510] sm:$0xff] }
 0x417   :  { %v3709_v15 = vcombine.low %v1306_v49, %v1310_v59 }
 0x418   :  { %2877 = vmatpush1.bf16.msra.mxu0 %v3645_v9  ;;  %v3710_v9 = vcombine.high %v1306_v49, %v1310_v59  ;;  %v1363_v49 = vld [vmem:[#allocation13 + $0x6d8] sm:$0xff] }
 0x419   :  { %2963 = vmatpush1.bf16.msra.mxu1 %v3647_v10  ;;  %2878 = vmatprep.subr.bf16.mxu0 %v3654_v11  ;;  %v3712_v10 = vcombine.high %v1307_v2, %v1311_v6  ;;  %v1314_v11 = vld [vmem:[#allocation13 + $0x550] sm:$0xff]  ;;  %v1367_v59 = vld [vmem:[#allocation13 + $0x6f8] sm:$0xff] }
 0x41a   :  { %2964 = vmatprep.subr.bf16.mxu1 %v3656_v12  ;;  %v1318_v12 = vld [vmem:[#allocation13 + $0x570] sm:$0xff] }
 0x41b   :  { %v3717_v3 = vcombine.low %v1314_v11, %v1318_v12 }
 0x41c   :  { %2879 = vmatpush1.bf16.msra.mxu0 %v3653_v19  ;;  %v3718_v19 = vcombine.high %v1314_v11, %v1318_v12  ;;  %v1371_v11 = vld [vmem:[#allocation13 + $0x718] sm:$0xff] }
 0x41d   :  { %2965 = vmatpush1.bf16.msra.mxu1 %v3655_v20  ;;  %2880 = vmatprep.subr.bf16.mxu0 %v3662_v21  ;;  %v3720_v20 = vcombine.high %v1315_v13, %v1319_v14  ;;  %v1322_v21 = vld [vmem:[#allocation13 + $0x590] sm:$0xff]  ;;  %v1375_v12 = vld [vmem:[#allocation13 + $0x738] sm:$0xff]  ;;  %v3767_v14 = vcombine.low %v1363_v49, %v1367_v59 }
 0x41e   :  { %2966 = vmatprep.subr.bf16.mxu1 %v3664_v63  ;;  %v1326_v63 = vld [vmem:[#allocation13 + $0x5b0] sm:$0xff] }
 0x41f   :  { %v3725_v60 = vcombine.low %v1322_v21, %v1326_v63 }
 0x420   :  { %2881 = vmatpush1.bf16.msra.mxu0 %v3661_v5  ;;  %v3726_v5 = vcombine.high %v1322_v21, %v1326_v63  ;;  %v1379_v21 = vld [vmem:[#allocation13 + $0x758] sm:$0xff] }
 0x421   :  { %2967 = vmatpush1.bf16.msra.mxu1 %v3663_v50  ;;  %2882 = vmatprep.subr.bf16.mxu0 %v3670_v51  ;;  %v3728_v50 = vcombine.high %v1323_v0, %v1327_v1  ;;  %v1330_v51 = vld [vmem:[#allocation13 + $0x5d0] sm:$0xff]  ;;  %v1383_v63 = vld [vmem:[#allocation13 + $0x778] sm:$0xff]  ;;  %v3775_v1 = vcombine.low %v1371_v11, %v1375_v12 }
 0x422   :  { %2968 = vmatprep.subr.bf16.mxu1 %v3672_v22  ;;  %v1334_v22 = vld [vmem:[#allocation13 + $0x5f0] sm:$0xff] }
 0x424   :  { %2883 = vmatpush1.bf16.msra.mxu0 %v3669_v18  ;;  %v3734_v18 = vcombine.high %v1330_v51, %v1334_v22 }
 0x425   :  { %2969 = vmatpush1.bf16.msra.mxu1 %v3671_v52  ;;  %2895 = vmatprep.subr.bf16.mxu0 %v3678_v28  ;;  %v3736_v52 = vcombine.high %v1331_v23, %v1335_v26  ;;  %v1338_v28 = vld [vmem:[#allocation13 + $0x610] sm:$0xff]  ;;  %v3783_v26 = vcombine.low %v1379_v21, %v1383_v63 }
 0x426   :  { %2981 = vmatprep.subr.bf16.mxu1 %v3680_v53  ;;  %v1342_v53 = vld [vmem:[#allocation13 + $0x630] sm:$0xff] }
 0x427   :  { %2885 = vmatmul.mubr.bf16.vlgmr.msra.gmra.mrb[12].mxu0 %v4500_v62  ;;  %v3742_v33 = vcombine.high %v1338_v28, %v1342_v53 }
 0x428   :  { %2971 = vmatmul.mubr.bf16.vlgmr.msra.gmra.mrb[12].mxu1 %v4500_v62  ;;  %2896 = vmatpush1.bf16.msra.mxu0 %v3677_v31  ;;  %v3695_v62 = vcombine.low %v1291_v47, %v1295_v55  ;;  %v3733_v31 = vcombine.low %v1330_v51, %v1334_v22  ;;  %v3741_v47 = vcombine.low %v1338_v28, %v1342_v53  ;;  %v1387_v51 = vld [vmem:[#allocation13 + $0x798] sm:$0xff] }
 0x429   :  { %2927 = vmatprep.mubr.bf16.mxu0 %v4504_v8  ;;  %2982 = vmatpush1.bf16.msra.mxu1 %v3679_v34  ;;  %v3744_v34 = vcombine.high %v1339_v29, %v1343_v30  ;;  %v3743_v55 = vcombine.low %v1339_v29, %v1343_v30  ;;  %v1391_v22 = vld [vmem:[#allocation13 + $0x7b8] sm:$0xff] }
 0x42a   :  { %3013 = vmatprep.mubr.bf16.mxu1 %v4504_v8  ;;  %2897 = vmatprep.subr.bf16.mxu0 %v3686_v35  ;;  %v3701_v8 = vcombine.low %v1298_v40, %v1302_v41  ;;  %v1346_v35 = vld [vmem:[#allocation13 + $0x650] sm:$0xff]  ;;  %v1355_v40 = vld [vmem:[#allocation13 + $0x698] sm:$0xff]  ;;  %v3791_v30 = vcombine.low %v1387_v51, %v1391_v22 }
 0x42b   :  { %2983 = vmatprep.subr.bf16.mxu1 %v3688_v54  ;;  %v1351_v54 = vld [vmem:[#allocation13 + $0x678] sm:$0xff]  ;;  %v3749_v42 = vcombine.low %v1346_v35, %v1350_v36 }
 0x42c   :  { %2898 = vmatpush1.bf16.msra.mxu0 %v3685_v38  ;;  %v3750_v38 = vcombine.high %v1346_v35, %v1350_v36  ;;  %v1359_v41 = vld [vmem:[#allocation13 + $0x6b8] sm:$0xff]  ;;  %v3751_v43 = vcombine.low %v1347_v37, %v1351_v54 }
 0x42d   :  { %2984 = vmatpush1.bf16.msra.mxu1 %v3687_v39  ;;  %2899 = vmatprep.subr.bf16.mxu0 %v3694_v56  ;;  %v3752_v39 = vcombine.high %v1347_v37, %v1351_v54  ;;  %v1354_v56 = vld [vmem:[#allocation13 + $0x690] sm:$0xff]  ;;  %v3759_v6 = vcombine.low %v1355_v40, %v1359_v41  ;;  %v1395_v28 = vld [vmem:[#allocation13 + $0x7d8] sm:$0xff] }
 0x42e   :  { %2985 = vmatprep.subr.bf16.mxu1 %v3696_v57  ;;  %v1358_v57 = vld [vmem:[#allocation13 + $0x6b0] sm:$0xff]  ;;  %v1399_v53 = vld [vmem:[#allocation13 + $0x7f8] sm:$0xff] }
 0x42f   :  { %v3757_v2 = vcombine.low %v1354_v56, %v1358_v57 }
 0x430   :  { %2900 = vmatpush1.bf16.msra.mxu0 %v3693_v44  ;;  %v3758_v44 = vcombine.high %v1354_v56, %v1358_v57 }
 0x431   :  { %2986 = vmatpush1.bf16.msra.mxu1 %v3695_v62  ;;  %2901 = vmatprep.subr.bf16.mxu0 %v3702_v45  ;;  %v3760_v62 = vcombine.high %v1355_v40, %v1359_v41  ;;  %v1362_v45 = vld [vmem:[#allocation13 + $0x6d0] sm:$0xff] }
 0x432   :  { %2987 = vmatprep.subr.bf16.mxu1 %v3704_v46  ;;  %v1366_v46 = vld [vmem:[#allocation13 + $0x6f0] sm:$0xff] }
 0x433   :  { %v3765_v13 = vcombine.low %v1362_v45, %v1366_v46 }
 0x434   :  { %2902 = vmatpush1.bf16.msra.mxu0 %v3701_v8  ;;  %v3766_v8 = vcombine.high %v1362_v45, %v1366_v46 }
 0x435   :  { %2988 = vmatpush1.bf16.msra.mxu1 %v3703_v7  ;;  %2903 = vmatprep.subr.bf16.mxu0 %v3710_v9  ;;  %v3768_v7 = vcombine.high %v1363_v49, %v1367_v59  ;;  %v1370_v9 = vld [vmem:[#allocation13 + $0x710] sm:$0xff] }
 0x436   :  { %2989 = vmatprep.subr.bf16.mxu1 %v3712_v10  ;;  %v1374_v10 = vld [vmem:[#allocation13 + $0x730] sm:$0xff] }
 0x437   :  { %v3773_v0 = vcombine.low %v1370_v9, %v1374_v10 }
 0x438   :  { %2904 = vmatpush1.bf16.msra.mxu0 %v3709_v15  ;;  %v3774_v15 = vcombine.high %v1370_v9, %v1374_v10 }
 0x439   :  { %2990 = vmatpush1.bf16.msra.mxu1 %v3711_v16  ;;  %2905 = vmatprep.subr.bf16.mxu0 %v3718_v19  ;;  %v3776_v16 = vcombine.high %v1371_v11, %v1375_v12  ;;  %v1378_v19 = vld [vmem:[#allocation13 + $0x750] sm:$0xff] }
 0x43a   :  { %2991 = vmatprep.subr.bf16.mxu1 %v3720_v20  ;;  %v1382_v20 = vld [vmem:[#allocation13 + $0x770] sm:$0xff] }
 0x43b   :  { %v3781_v23 = vcombine.low %v1378_v19, %v1382_v20 }
 0x43c   :  { %2906 = vmatpush1.bf16.msra.mxu0 %v3717_v3  ;;  %v3782_v3 = vcombine.high %v1378_v19, %v1382_v20 }
 0x43d   :  { %2992 = vmatpush1.bf16.msra.mxu1 %v3719_v4  ;;  %2907 = vmatprep.subr.bf16.mxu0 %v3726_v5  ;;  %v3784_v4 = vcombine.high %v1379_v21, %v1383_v63  ;;  %v1386_v5 = vld [vmem:[#allocation13 + $0x790] sm:$0xff] }
 0x43e   :  { %2993 = vmatprep.subr.bf16.mxu1 %v3728_v50  ;;  %v1390_v50 = vld [vmem:[#allocation13 + $0x7b0] sm:$0xff] }
 0x43f   :  { %v3789_v29 = vcombine.low %v1386_v5, %v1390_v50 }
 0x440   :  { %2908 = vmatpush1.bf16.msra.mxu0 %v3725_v60  ;;  %v3790_v60 = vcombine.high %v1386_v5, %v1390_v50 }
 0x441   :  { %2994 = vmatpush1.bf16.msra.mxu1 %v3727_v61  ;;  %2909 = vmatprep.subr.bf16.mxu0 %v3734_v18  ;;  %v3792_v61 = vcombine.high %v1387_v51, %v1391_v22  ;;  %v1394_v18 = vld [vmem:[#allocation13 + $0x7d0] sm:$0xff] }
 0x442   :  { %2995 = vmatprep.subr.bf16.mxu1 %v3736_v52  ;;  %v1398_v52 = vld [vmem:[#allocation13 + $0x7f0] sm:$0xff] }
 0x444   :  { %2910 = vmatpush1.bf16.msra.mxu0 %v3733_v31  ;;  %v3798_v31 = vcombine.high %v1394_v18, %v1398_v52 }
 0x445   :  { %2996 = vmatpush1.bf16.msra.mxu1 %v3735_v32  ;;  %2911 = vmatprep.subr.bf16.mxu0 %v3742_v33  ;;  %v3800_v32 = vcombine.high %v1395_v28, %v1399_v53  ;;  %v3797_v33 = vcombine.low %v1394_v18, %v1398_v52 }
 0x446   :  { %2997 = vmatprep.subr.bf16.mxu1 %v3744_v34  ;;  %v3799_v34 = vcombine.low %v1395_v28, %v1399_v53 }
 0x448   :  { %2912 = vmatpush1.bf16.msra.mxu0 %v3741_v47 }
 0x449   :  { %2998 = vmatpush1.bf16.msra.mxu1 %v3743_v55  ;;  %2913 = vmatprep.subr.bf16.mxu0 %v3750_v38 }
 0x44a   :  { %2999 = vmatprep.subr.bf16.mxu1 %v3752_v39 }
 0x44c   :  { %2914 = vmatpush1.bf16.msra.mxu0 %v3749_v42 }
 0x44d   :  { %3000 = vmatpush1.bf16.msra.mxu1 %v3751_v43  ;;  %2915 = vmatprep.subr.bf16.mxu0 %v3758_v44 }
 0x44e   :  { %3001 = vmatprep.subr.bf16.mxu1 %v3760_v62 }
 0x450   :  { %2916 = vmatpush1.bf16.msra.mxu0 %v3757_v2 }
 0x451   :  { %3002 = vmatpush1.bf16.msra.mxu1 %v3759_v6  ;;  %2917 = vmatprep.subr.bf16.mxu0 %v3766_v8 }
 0x452   :  { %3003 = vmatprep.subr.bf16.mxu1 %v3768_v7 }
 0x454   :  { %2918 = vmatpush1.bf16.msra.mxu0 %v3765_v13 }
 0x455   :  { %3004 = vmatpush1.bf16.msra.mxu1 %v3767_v14  ;;  %2919 = vmatprep.subr.bf16.mxu0 %v3774_v15 }
 0x456   :  { %3005 = vmatprep.subr.bf16.mxu1 %v3776_v16 }
 0x458   :  { %2920 = vmatpush1.bf16.msra.mxu0 %v3773_v0 }
 0x459   :  { %3006 = vmatpush1.bf16.msra.mxu1 %v3775_v1  ;;  %2921 = vmatprep.subr.bf16.mxu0 %v3782_v3 }
 0x45a   :  { %3007 = vmatprep.subr.bf16.mxu1 %v3784_v4 }
 0x45c   :  { %2922 = vmatpush1.bf16.msra.mxu0 %v3781_v23 }
 0x45d   :  { %3008 = vmatpush1.bf16.msra.mxu1 %v3783_v26  ;;  %2923 = vmatprep.subr.bf16.mxu0 %v3790_v60 }
 0x45e   :  { %3009 = vmatprep.subr.bf16.mxu1 %v3792_v61 }
 0x460   :  { %2924 = vmatpush1.bf16.msra.mxu0 %v3789_v29 }
 0x461   :  { %3010 = vmatpush1.bf16.msra.mxu1 %v3791_v30  ;;  %2925 = vmatprep.subr.bf16.mxu0 %v3798_v31 }
 0x462   :  { %3011 = vmatprep.subr.bf16.mxu1 %v3800_v32 }
 0x464   :  { %2926 = vmatpush1.bf16.msra.mxu0 %v3797_v33 }
 0x465   :  { %3012 = vmatpush1.bf16.msra.mxu1 %v3799_v34 }
 0x467   :  { %2928 = vmatmul.mubr.bf16.vlgmr.msra.gmra.mrb[12].mxu0 %v4517_v17 }
 0x468   :  { %3014 = vmatmul.mubr.bf16.vlgmr.msra.gmra.mrb[12].mxu1 %v4517_v17 }
 0x4ba   :  { %v2757_v35 = vpop.f32.mrb[8].mxu0  ;;  %v2843_v36 = vpop.f32.mrb[8].mxu1 }
 0x4bb   :  { %v2759_v37 = vpop.f32.mrb[9].mxu0  ;;  %v2845_v54 = vpop.f32.mrb[9].mxu1 }
 0x4bc   :  { %v2761_v47 = vpop.f32.mrb[10].mxu0  ;;  %v2847_v55 = vpop.f32.mrb[10].mxu1 }
 0x4bd   :  { %v3026_v38 = vadd.f32 %v2761_v47, %v2757_v35  ;;  %v3040_v39 = vadd.f32 %v2847_v55, %v2843_v36  ;;  %v2763_v56 = vpop.f32.mrb[11].mxu0  ;;  %v2849_v57 = vpop.f32.mrb[11].mxu1 }
 0x4be   :  { %v3033_v40 = vadd.f32 %v2763_v56, %v2759_v37  ;;  %v3047_v41 = vadd.f32 %v2849_v57, %v2845_v54 }
 0x4bf   :  { %v3027_v42 = vrot.slane %v3026_v38, 4  ;;  %v3041_v43 = vrot.slane %v3040_v39, 4 }
 0x4c0   :  { %v3034_v44 = vrot.slane %v3033_v40, 4  ;;  %v3048_v62 = vrot.slane %v3047_v41, 4 }
 0x4c1   :  { %v3028_v45 = vadd.f32 %v3027_v42, %v3026_v38  ;;  %v3042_v46 = vadd.f32 %v3041_v43, %v3040_v39 }
 0x4c2   :  { %v3035_v49 = vadd.f32 %v3034_v44, %v3033_v40  ;;  %v3049_v17 = vadd.f32 %v3048_v62, %v3047_v41 }
 0x4c3   :  { %v3029_v59 = vrot.slane %v3028_v45, 2  ;;  %v3043_v2 = vrot.slane %v3042_v46, 2 }
 0x4c4   :  { %v3036_v6 = vrot.slane %v3035_v49, 2  ;;  %v3050_v8 = vrot.slane %v3049_v17, 2 }
 0x4c5   :  { %v3030_v7 = vadd.f32 %v3029_v59, %v3028_v45  ;;  %v3044_v9 = vadd.f32 %v3043_v2, %v3042_v46 }
 0x4c6   :  { %v3037_v10 = vadd.f32 %v3036_v6, %v3035_v49  ;;  %v3051_v11 = vadd.f32 %v3050_v8, %v3049_v17 }
 0x4c7   :  { %v3031_v12 = vrot.slane %v3030_v7, 1  ;;  %v3045_v13 = vrot.slane %v3044_v9, 1 }
 0x4c8   :  { %v3038_v14 = vrot.slane %v3037_v10, 1  ;;  %v3052_v15 = vrot.slane %v3051_v11, 1 }
 0x4c9   :  { %v3032_v16 = vadd.f32 %v3031_v12, %v3030_v7  ;;  %v3046_v19 = vadd.f32 %v3045_v13, %v3044_v9 }
 0x4ca   :  { %v3039_v20 = vadd.f32 %v3038_v14, %v3037_v10  ;;  %v3053_v21 = vadd.f32 %v3052_v15, %v3051_v11 }
 0x4cb   :  { %v3082_v63 = vmul.f32 0.0625, %v3032_v16  ;;  %v3084_v0 = vmul.f32 0.0625, %v3046_v19  ;;  %v4569_v19 = vld [vmem:[%s4677_s10] sm:$0xff]  ;;  %s4241_s10 = smov [#allocation14]  }
 0x4cc   :  { %v3083_v1 = vmul.f32 0.0625, %v3039_v20  ;;  %v3085_v3 = vmul.f32 0.0625, %v3053_v21  ;;  %v4574_v20 = vld [vmem:[%s4678_s11] sm:$0xff]  ;;  %v3222_v21 = vrot.slane %v4569_v19, %v4403_v25  ;;  %s3441_s11 = sshll.u32 %s4241_s10, 4  ;;  %s3442_s11 = int_to_ptr.vmem [resolvable:$true] %s3441_s11 }
 0x4cd   :  { %v4534_v4 = vsub.f32 %v2757_v35, %v3082_v63  ;;  %v4536_v5 = vsub.f32 %v2761_v47, %v3082_v63  ;;  %v4538_v50 = vsub.f32 %v2843_v36, %v3084_v0  ;;  %v4540_v51 = vsub.f32 %v2847_v55, %v3084_v0  ;;  %s4191_s20 = scalar_lea.vmem %s3442_s11, 1024  ;;  %p4196_p1 = scmp.lt.s32.totalorder %s3442_s11, %s3442_s11 }
 0x4ce   :  { %v4542_v22 = vsub.f32 %v2759_v37, %v3083_v1  ;;  %v4544_v23 = vsub.f32 %v2763_v56, %v3083_v1  ;;  %v4546_v26 = vsub.f32 %v2845_v54, %v3085_v3  ;;  %v4548_v60 = vsub.f32 %v2849_v57, %v3085_v3  ;;  %p4192_p0 = scmp.ne.s32.totalorder %s3442_s11, %s4191_s20  ;;  %p4197_p2 = scmp.lt.s32.totalorder %s4191_s20, %s4191_s20 }
 0x4cf   :  { %v3106_v61 = vmul.f32 %v4534_v4, %v4534_v4  ;;  %v3114_v18 = vmul.f32 %v4536_v5, %v4536_v5  ;;  %v3108_v52 = vmul.f32 %v4538_v50, %v4538_v50  ;;  %v3116_v28 = vmul.f32 %v4540_v51, %v4540_v51 }
 0x4d0   :  { %v3107_v53 = vmul.f32 %v4542_v22, %v4542_v22  ;;  %v3115_v29 = vmul.f32 %v4544_v23, %v4544_v23  ;;  %v3109_v30 = vmul.f32 %v4546_v26, %v4546_v26  ;;  %v3117_v31 = vmul.f32 %v4548_v60, %v4548_v60  ;;  %p4198_p3 = por %p4197_p2, %p4196_p1 }
 0x4d1   :  { %v3122_v32 = vadd.f32 %v3114_v18, %v3106_v61  ;;  %v3136_v33 = vadd.f32 %v3116_v28, %v3108_v52  ;;  %v3279_v0 = vrot.slane %v4574_v20, %v4403_v25  ;;  %v3230_v1 = vrot.slane %v4569_v19, %v4467_v48 }
 0x4d2   :  { %v3129_v34 = vadd.f32 %v3115_v29, %v3107_v53  ;;  %v3143_v35 = vadd.f32 %v3117_v31, %v3109_v30  ;;  %v3226_v3 = vrot.slane %v4569_v19, %v4409_v27  ;;  %v3287_v28 = vrot.slane %v4574_v20, %v4467_v48  ;;  %p4199_p4 = pnand %p4198_p3, %p4192_p0 }
 0x4d3   :  { %v3123_v36 = vrot.slane %v3122_v32, 4  ;;  %v3137_v37 = vrot.slane %v3136_v33, 4  ;;  %v3234_v53 = vrot.slane %v4569_v19, %v4473_v58  ;;  %v3283_v31 = vrot.slane %v4574_v20, %v4409_v27 }
 0x4d4   :  { %v3130_v54 = vrot.slane %v3129_v34, 4  ;;  %v3144_v47 = vrot.slane %v3143_v35, 4 }
 0x4d5   :  { %v3124_v55 = vadd.f32 %v3123_v36, %v3122_v32  ;;  %v3138_v38 = vadd.f32 %v3137_v37, %v3136_v33  ;;  %v3291_v32 = vrot.slane %v4574_v20, %v4473_v58 }
 0x4d6   :  { %v3131_v39 = vadd.f32 %v3130_v54, %v3129_v34  ;;  %v3145_v56 = vadd.f32 %v3144_v47, %v3143_v35 }
 0x4d7   :  { %v3125_v57 = vrot.slane %v3124_v55, 2  ;;  %v3139_v40 = vrot.slane %v3138_v38, 2 }
 0x4d8   :  { %v3132_v41 = vrot.slane %v3131_v39, 2  ;;  %v3146_v42 = vrot.slane %v3145_v56, 2 }
 0x4d9   :  { %v3126_v43 = vadd.f32 %v3125_v57, %v3124_v55  ;;  %v3140_v44 = vadd.f32 %v3139_v40, %v3138_v38 }
 0x4da   :  { %v3133_v62 = vadd.f32 %v3132_v41, %v3131_v39  ;;  %v3147_v45 = vadd.f32 %v3146_v42, %v3145_v56 }
 0x4db   :  { %v3127_v46 = vrot.slane %v3126_v43, 1  ;;  %v3141_v49 = vrot.slane %v3140_v44, 1 }
 0x4dc   :  { %v3134_v17 = vrot.slane %v3133_v62, 1  ;;  %v3148_v59 = vrot.slane %v3147_v45, 1 }
 0x4dd   :  { %v3128_v2 = vadd.f32 %v3127_v46, %v3126_v43  ;;  %v3142_v6 = vadd.f32 %v3141_v49, %v3140_v44 }
 0x4de   :  { %v3135_v8 = vadd.f32 %v3134_v17, %v3133_v62  ;;  %v3149_v7 = vadd.f32 %v3148_v59, %v3147_v45 }
 0x4df   :  { %v3178_v9 = vmul.f32 0.0625, %v3128_v2  ;;  %v3180_v10 = vmul.f32 0.0625, %v3142_v6 }
 0x4e0   :  { %v3179_v11 = vmul.f32 0.0625, %v3135_v8  ;;  %v3181_v12 = vmul.f32 0.0625, %v3149_v7 }
 0x4e1   :  { %v3186_v13 = vadd.f32 0.8, %v3178_v9  ;;  %v3188_v14 = vadd.f32 0.8, %v3180_v10 }
 0x4e2   :  { %v3187_v15 = vadd.f32 0.8, %v3179_v11  ;;  %v3189_v16 = vadd.f32 0.8, %v3181_v12 }
 0x4e3   :  { %4021 = vrsqrt.f32 %v3186_v13 }
 0x4e4   :  { %4023 = vrsqrt.f32 %v3188_v14 }
 0x4e5   :  { %4025 = vrsqrt.f32 %v3187_v15 }
 0x4e6   :  { %4027 = vrsqrt.f32 %v3189_v16 }
 0x4ed   :  { %v4022_v63 = vpop.eup %4021 }
 0x4ee   :  { %v4024_v61 = vpop.eup %4023  ;;  %v3202_v18 = vmul.f32 %v4022_v63, %v4534_v4  ;;  %v3210_v52 = vmul.f32 %v4022_v63, %v4536_v5 }
 0x4ef   :  { %v4026_v29 = vpop.eup %4025  ;;  %v3204_v25 = vmul.f32 %v4024_v61, %v4538_v50  ;;  %v3212_v30 = vmul.f32 %v4024_v61, %v4540_v51 }
 0x4f0   :  { %v4028_v4 = vpop.eup %4027  ;;  %v3259_v33 = vmul.f32 %v3222_v21, %v3202_v18  ;;  %v3267_v5 = vmul.f32 %v3222_v21, %v3210_v52  ;;  %v3203_v34 = vmul.f32 %v4026_v29, %v4542_v22  ;;  %v3211_v48 = vmul.f32 %v4026_v29, %v4544_v23 }
 0x4f1   :  { %v3261_v35 = vmul.f32 %v3230_v1, %v3204_v25  ;;  %v3269_v36 = vmul.f32 %v3230_v1, %v3212_v30  ;;  %v3205_v37 = vmul.f32 %v4028_v4, %v4546_v26  ;;  %v3213_v50 = vmul.f32 %v4028_v4, %v4548_v60 }
 0x4f2   :  { %v3316_v51 = vadd.f32 %v3279_v0, %v3259_v33  ;;  %v3324_v54 = vadd.f32 %v3279_v0, %v3267_v5  ;;  %v3260_v47 = vmul.f32 %v3226_v3, %v3203_v34  ;;  %v3268_v27 = vmul.f32 %v3226_v3, %v3211_v48 }
 0x4f3   :  { %v3318_v55 = vadd.f32 %v3287_v28, %v3261_v35  ;;  %v3326_v38 = vadd.f32 %v3287_v28, %v3269_v36  ;;  %v3262_v58 = vmul.f32 %v3234_v53, %v3205_v37  ;;  %v3270_v39 = vmul.f32 %v3234_v53, %v3213_v50 }
 0x4f4   :  { %vm3332_vm15 = vcmp.gt.f32.partialorder %v3316_v51, 0.0  ;;  %vm3340_vm0 = vcmp.gt.f32.partialorder %v3324_v54, 0.0  ;;  %v3348_v56 = vmul.f32 0.2, %v3316_v51  ;;  %v3356_v22 = vmul.f32 0.2, %v3324_v54 }
 0x4f5   :  { %vm3334_vm1 = vcmp.gt.f32.partialorder %v3318_v55, 0.0  ;;  %vm3342_vm2 = vcmp.gt.f32.partialorder %v3326_v38, 0.0  ;;  %v3350_v23 = vmul.f32 0.2, %v3318_v55  ;;  %v3358_v57 = vmul.f32 0.2, %v3326_v38 }
 0x4f6   :  { %v3364_v40 = vsel %vm3332_vm15, %v3316_v51, %v3348_v56  ;;  %v3372_v26 = vsel %vm3340_vm0, %v3324_v54, %v3356_v22  ;;  %v3317_v41 = vadd.f32 %v3283_v31, %v3260_v47  ;;  %v3325_v60 = vadd.f32 %v3283_v31, %v3268_v27 }
 0x4f7   :  { %v3366_v42 = vsel %vm3334_vm1, %v3318_v55, %v3350_v23  ;;  %v3374_v43 = vsel %vm3342_vm2, %v3326_v38, %v3358_v57  ;;  %v3319_v44 = vadd.f32 %v3291_v32, %v3262_v58  ;;  %v3327_v62 = vadd.f32 %v3291_v32, %v3270_v39 }
 0x4f8   :  { %vm3333_vm3 = vcmp.gt.f32.partialorder %v3317_v41, 0.0  ;;  %vm3341_vm4 = vcmp.gt.f32.partialorder %v3325_v60, 0.0  ;;  %v3349_v45 = vmul.f32 0.2, %v3317_v41  ;;  %v3357_v46 = vmul.f32 0.2, %v3325_v60 }
 0x4f9   :  { %vm3335_vm5 = vcmp.gt.f32.partialorder %v3319_v44, 0.0  ;;  %vm3343_vm6 = vcmp.gt.f32.partialorder %v3327_v62, 0.0  ;;  %v3351_v49 = vmul.f32 0.2, %v3319_v44  ;;  %v3359_v17 = vmul.f32 0.2, %v3327_v62 }
 0x4fa   :  { %v3365_v59 = vsel %vm3333_vm3, %v3317_v41, %v3349_v45  ;;  %v3373_v2 = vsel %vm3341_vm4, %v3325_v60, %v3357_v46 }
 0x4fb   :  { %v3809_v6 = vpack.c.bf16 %v3365_v59, %v3364_v40  ;;  %v3813_v8 = vpack.c.bf16 %v3373_v2, %v3372_v26  ;;  %v3367_v7 = vsel %vm3335_vm5, %v3319_v44, %v3351_v49  ;;  %v3375_v9 = vsel %vm3343_vm6, %v3327_v62, %v3359_v17 }
 0x4fc   :  { %v3810_v10 = vpack.c.bf16 %v3367_v7, %v3366_v42  ;;  %v3814_v11 = vpack.c.bf16 %v3375_v9, %v3374_v43 }
 0x4fd   :  { %3428 = vst [vmem:[#allocation14] sm:$0xff] %v3809_v6  ;;  %3432 = vst [vmem:[#allocation14 + $0x20] sm:$0xff] %v3813_v8 }
 0x4fe   :  { %3429 = vst [vmem:[#allocation14 + $0x8] sm:$0xff] %v3810_v10  ;;  %3433 = vst [vmem:[#allocation14 + $0x28] sm:$0xff] %v3814_v11 }
 0x53a   :  { %v2929_v12 = vpop.f32.mrb[12].mxu0 }
 0x53b   :  { %v3015_v13 = vpop.f32.mrb[12].mxu1  ;;  %v2931_v14 = vpop.f32.mrb[13].mxu0 }
 0x53c   :  { %v3017_v15 = vpop.f32.mrb[13].mxu1  ;;  %v2933_v16 = vpop.f32.mrb[14].mxu0 }
 0x53d   :  { %v3054_v21 = vadd.f32 %v2933_v16, %v2929_v12  ;;  %v3019_v63 = vpop.f32.mrb[14].mxu1  ;;  %v2935_v0 = vpop.f32.mrb[15].mxu0 }
 0x53e   :  { %v3068_v1 = vadd.f32 %v3019_v63, %v3015_v13  ;;  %v3061_v3 = vadd.f32 %v2935_v0, %v2931_v14  ;;  %v3021_v61 = vpop.f32.mrb[15].mxu1 }
 0x53f   :  { %v3055_v18 = vrot.slane %v3054_v21, 4  ;;  %v3075_v52 = vadd.f32 %v3021_v61, %v3017_v15 }
 0x540   :  { %v3069_v28 = vrot.slane %v3068_v1, 4  ;;  %v3062_v53 = vrot.slane %v3061_v3, 4 }
 0x541   :  { %v3056_v29 = vadd.f32 %v3055_v18, %v3054_v21  ;;  %v3076_v25 = vrot.slane %v3075_v52, 4 }
 0x542   :  { %v3070_v30 = vadd.f32 %v3069_v28, %v3068_v1  ;;  %v3063_v31 = vadd.f32 %v3062_v53, %v3061_v3 }
 0x543   :  { %v3057_v32 = vrot.slane %v3056_v29, 2  ;;  %v3077_v4 = vadd.f32 %v3076_v25, %v3075_v52 }
 0x544   :  { %v3071_v33 = vrot.slane %v3070_v30, 2  ;;  %v3064_v5 = vrot.slane %v3063_v31, 2 }
 0x545   :  { %v3058_v34 = vadd.f32 %v3057_v32, %v3056_v29  ;;  %v3078_v48 = vrot.slane %v3077_v4, 2 }
 0x546   :  { %v3072_v35 = vadd.f32 %v3071_v33, %v3070_v30  ;;  %v3065_v36 = vadd.f32 %v3064_v5, %v3063_v31 }
 0x547   :  { %v3059_v37 = vrot.slane %v3058_v34, 1  ;;  %v3079_v50 = vadd.f32 %v3078_v48, %v3077_v4 }
 0x548   :  { %v3073_v51 = vrot.slane %v3072_v35, 1  ;;  %v3066_v54 = vrot.slane %v3065_v36, 1 }
 0x549   :  { %v3060_v47 = vadd.f32 %v3059_v37, %v3058_v34  ;;  %v3080_v27 = vrot.slane %v3079_v50, 1 }
 0x54a   :  { %v3074_v55 = vadd.f32 %v3073_v51, %v3072_v35  ;;  %v3067_v38 = vadd.f32 %v3066_v54, %v3065_v36 }
 0x54b   :  { %v3086_v58 = vmul.f32 0.0625, %v3060_v47  ;;  %v3081_v39 = vadd.f32 %v3080_v27, %v3079_v50  ;;  %v3237_v47 = vsub.s32 4, %v4400_v24  ;;  %v3245_v27 = vsub.s32 6, %v4400_v24 }
 0x54c   :  { %v3088_v56 = vmul.f32 0.0625, %v3074_v55  ;;  %v3087_v22 = vmul.f32 0.0625, %v3067_v38  ;;  %v3241_v55 = vsub.s32 5, %v4400_v24  ;;  %v3249_v38 = vsub.s32 7, %v4400_v24 }
 0x54d   :  { %v4600_v23 = vsub.f32 %v2929_v12, %v3086_v58  ;;  %v4602_v57 = vsub.f32 %v2933_v16, %v3086_v58  ;;  %v3089_v40 = vmul.f32 0.0625, %v3081_v39  ;;  %v3238_v58 = vrot.slane %v4569_v19, %v3237_v47 }
 0x54e   :  { %v4604_v26 = vsub.f32 %v3015_v13, %v3088_v56  ;;  %v4606_v41 = vsub.f32 %v3019_v63, %v3088_v56  ;;  %v4608_v60 = vsub.f32 %v2931_v14, %v3087_v22  ;;  %v4610_v42 = vsub.f32 %v2935_v0, %v3087_v22 }
 0x54f   :  { %v3110_v43 = vmul.f32 %v4600_v23, %v4600_v23  ;;  %v3118_v44 = vmul.f32 %v4602_v57, %v4602_v57  ;;  %v4616_v62 = vsub.f32 %v3017_v15, %v3089_v40  ;;  %v4618_v45 = vsub.f32 %v3021_v61, %v3089_v40 }
 0x550   :  { %v3112_v46 = vmul.f32 %v4604_v26, %v4604_v26  ;;  %v3120_v49 = vmul.f32 %v4606_v41, %v4606_v41  ;;  %v3111_v17 = vmul.f32 %v4608_v60, %v4608_v60  ;;  %v3119_v59 = vmul.f32 %v4610_v42, %v4610_v42 }
 0x551   :  { %v3150_v2 = vadd.f32 %v3118_v44, %v3110_v43  ;;  %v3113_v6 = vmul.f32 %v4616_v62, %v4616_v62  ;;  %v3121_v8 = vmul.f32 %v4618_v45, %v4618_v45  ;;  %v3295_v56 = vrot.slane %v4574_v20, %v3237_v47 }
 0x552   :  { %v3164_v7 = vadd.f32 %v3120_v49, %v3112_v46  ;;  %v3157_v9 = vadd.f32 %v3119_v59, %v3111_v17  ;;  %v3246_v22 = vrot.slane %v4569_v19, %v3245_v27  ;;  %v3303_v40 = vrot.slane %v4574_v20, %v3245_v27 }
 0x553   :  { %v3151_v10 = vrot.slane %v3150_v2, 4  ;;  %v3171_v11 = vadd.f32 %v3121_v8, %v3113_v6  ;;  %v3242_v49 = vrot.slane %v4569_v19, %v3241_v55  ;;  %v3299_v17 = vrot.slane %v4574_v20, %v3241_v55 }
 0x554   :  { %v3165_v12 = vrot.slane %v3164_v7, 4  ;;  %v3158_v13 = vrot.slane %v3157_v9, 4  ;;  %v3250_v6 = vrot.slane %v4569_v19, %v3249_v38  ;;  %v3307_v8 = vrot.slane %v4574_v20, %v3249_v38 }
 0x555   :  { %v3152_v14 = vadd.f32 %v3151_v10, %v3150_v2  ;;  %v3172_v15 = vrot.slane %v3171_v11, 4 }
 0x556   :  { %v3166_v16 = vadd.f32 %v3165_v12, %v3164_v7  ;;  %v3159_v21 = vadd.f32 %v3158_v13, %v3157_v9 }
 0x557   :  { %v3153_v63 = vrot.slane %v3152_v14, 2  ;;  %v3173_v0 = vadd.f32 %v3172_v15, %v3171_v11 }
 0x558   :  { %v3167_v1 = vrot.slane %v3166_v16, 2  ;;  %v3160_v3 = vrot.slane %v3159_v21, 2 }
 0x559   :  { %v3154_v61 = vadd.f32 %v3153_v63, %v3152_v14  ;;  %v3174_v18 = vrot.slane %v3173_v0, 2 }
 0x55a   :  { %v3168_v52 = vadd.f32 %v3167_v1, %v3166_v16  ;;  %v3161_v28 = vadd.f32 %v3160_v3, %v3159_v21 }
 0x55b   :  { %v3155_v53 = vrot.slane %v3154_v61, 1  ;;  %v3175_v29 = vadd.f32 %v3174_v18, %v3173_v0 }
 0x55c   :  { %v3169_v25 = vrot.slane %v3168_v52, 1  ;;  %v3162_v30 = vrot.slane %v3161_v28, 1 }
 0x55d   :  { %v3156_v31 = vadd.f32 %v3155_v53, %v3154_v61  ;;  %v3176_v32 = vrot.slane %v3175_v29, 1 }
 0x55e   :  { %v3170_v4 = vadd.f32 %v3169_v25, %v3168_v52  ;;  %v3163_v33 = vadd.f32 %v3162_v30, %v3161_v28 }
 0x55f   :  { %v3182_v5 = vmul.f32 0.0625, %v3156_v31  ;;  %v3177_v34 = vadd.f32 %v3176_v32, %v3175_v29 }
 0x560   :  { %v3184_v48 = vmul.f32 0.0625, %v3170_v4  ;;  %v3183_v35 = vmul.f32 0.0625, %v3163_v33 }
 0x561   :  { %v3190_v36 = vadd.f32 0.8, %v3182_v5  ;;  %v3185_v37 = vmul.f32 0.0625, %v3177_v34 }
 0x562   :  { %v3192_v50 = vadd.f32 0.8, %v3184_v48  ;;  %v3191_v51 = vadd.f32 0.8, %v3183_v35 }
 0x563   :  { %4029 = vrsqrt.f32 %v3190_v36  ;;  %v3193_v54 = vadd.f32 0.8, %v3185_v37 }
 0x564   :  { %4031 = vrsqrt.f32 %v3192_v50 }
 0x565   :  { %4033 = vrsqrt.f32 %v3191_v51 }
 0x566   :  { %4035 = vrsqrt.f32 %v3193_v54 }
 0x56d   :  { %v4030_v39 = vpop.eup %4029 }
 0x56e   :  { %v4032_v43 = vpop.eup %4031  ;;  %v3206_v44 = vmul.f32 %v4030_v39, %v4600_v23  ;;  %v3214_v46 = vmul.f32 %v4030_v39, %v4602_v57 }
 0x56f   :  { %v4034_v59 = vpop.eup %4033  ;;  %v3208_v24 = vmul.f32 %v4032_v43, %v4604_v26  ;;  %v3216_v2 = vmul.f32 %v4032_v43, %v4606_v41 }
 0x570   :  { %v4036_v7 = vpop.eup %4035  ;;  %v3263_v9 = vmul.f32 %v3238_v58, %v3206_v44  ;;  %v3271_v10 = vmul.f32 %v3238_v58, %v3214_v46  ;;  %v3207_v23 = vmul.f32 %v4034_v59, %v4608_v60  ;;  %v3215_v57 = vmul.f32 %v4034_v59, %v4610_v42 }
 0x571   :  { %v3265_v11 = vmul.f32 %v3246_v22, %v3208_v24  ;;  %v3273_v12 = vmul.f32 %v3246_v22, %v3216_v2  ;;  %v3209_v13 = vmul.f32 %v4036_v7, %v4616_v62  ;;  %v3217_v14 = vmul.f32 %v4036_v7, %v4618_v45 }
 0x572   :  { %v3320_v26 = vadd.f32 %v3295_v56, %v3263_v9  ;;  %v3328_v15 = vadd.f32 %v3295_v56, %v3271_v10  ;;  %v3264_v41 = vmul.f32 %v3242_v49, %v3207_v23  ;;  %v3272_v16 = vmul.f32 %v3242_v49, %v3215_v57 }
 0x573   :  { %v3322_v19 = vadd.f32 %v3303_v40, %v3265_v11  ;;  %v3330_v21 = vadd.f32 %v3303_v40, %v3273_v12  ;;  %v3266_v20 = vmul.f32 %v3250_v6, %v3209_v13  ;;  %v3274_v63 = vmul.f32 %v3250_v6, %v3217_v14 }
 0x574   :  { %vm3336_vm7 = vcmp.gt.f32.partialorder %v3320_v26, 0.0  ;;  %vm3344_vm8 = vcmp.gt.f32.partialorder %v3328_v15, 0.0  ;;  %v3352_v0 = vmul.f32 0.2, %v3320_v26  ;;  %v3360_v60 = vmul.f32 0.2, %v3328_v15 }
 0x575   :  { %vm3338_vm9 = vcmp.gt.f32.partialorder %v3322_v19, 0.0  ;;  %vm3346_vm10 = vcmp.gt.f32.partialorder %v3330_v21, 0.0  ;;  %v3354_v42 = vmul.f32 0.2, %v3322_v19  ;;  %v3362_v1 = vmul.f32 0.2, %v3330_v21 }
 0x576   :  { %v3368_v3 = vsel %vm3336_vm7, %v3320_v26, %v3352_v0  ;;  %v3376_v62 = vsel %vm3344_vm8, %v3328_v15, %v3360_v60  ;;  %v3321_v61 = vadd.f32 %v3299_v17, %v3264_v41  ;;  %v3329_v45 = vadd.f32 %v3299_v17, %v3272_v16 }
 0x577   :  { %v3370_v18 = vsel %vm3338_vm9, %v3322_v19, %v3354_v42  ;;  %v3378_v52 = vsel %vm3346_vm10, %v3330_v21, %v3362_v1  ;;  %v3323_v28 = vadd.f32 %v3307_v8, %v3266_v20  ;;  %v3331_v53 = vadd.f32 %v3307_v8, %v3274_v63 }
 0x578   :  { %vm3337_vm11 = vcmp.gt.f32.partialorder %v3321_v61, 0.0  ;;  %vm3345_vm12 = vcmp.gt.f32.partialorder %v3329_v45, 0.0  ;;  %v3353_v29 = vmul.f32 0.2, %v3321_v61  ;;  %v3361_v25 = vmul.f32 0.2, %v3329_v45 }
 0x579   :  { %vm3339_vm13 = vcmp.gt.f32.partialorder %v3323_v28, 0.0  ;;  %vm3347_vm14 = vcmp.gt.f32.partialorder %v3331_v53, 0.0  ;;  %v3355_v30 = vmul.f32 0.2, %v3323_v28  ;;  %v3363_v31 = vmul.f32 0.2, %v3331_v53 }
 0x57a   :  { %v3369_v32 = vsel %vm3337_vm11, %v3321_v61, %v3353_v29  ;;  %v3377_v4 = vsel %vm3345_vm12, %v3329_v45, %v3361_v25 }
 0x57b   :  { %v3811_v33 = vpack.c.bf16 %v3369_v32, %v3368_v3  ;;  %v3815_v5 = vpack.c.bf16 %v3377_v4, %v3376_v62  ;;  %v3371_v34 = vsel %vm3339_vm13, %v3323_v28, %v3355_v30  ;;  %v3379_v48 = vsel %vm3347_vm14, %v3331_v53, %v3363_v31 }
 0x57c   :  { %v3812_v35 = vpack.c.bf16 %v3371_v34, %v3370_v18  ;;  %v3816_v36 = vpack.c.bf16 %v3379_v48, %v3378_v52 }
 0x57d   :  { %3430 = vst [vmem:[#allocation14 + $0x10] sm:$0xff] %v3811_v33  ;;  %3434 = vst [vmem:[#allocation14 + $0x30] sm:$0xff] %v3815_v5 }
 0x57e   :  { %3431 = vst [vmem:[#allocation14 + $0x18] sm:$0xff] %v3812_v35  ;;  %3435 = vst [vmem:[#allocation14 + $0x38] sm:$0xff] %v3816_v36 }
 0x57f   :  { %4202 = shalt.err (!%p4199_p4)
}
 0x580   :  { %s4203_s2 = scalar_lea.hbm %s4679_s12, 1024 }
 0x581   :  { %p4204_p5 = scmp.ne.s32.totalorder %s4679_s12, %s4203_s2  ;;  %p4207_p6 = scmp.lt.u32.totalorder %s4203_s2, %s4679_s12 }
 0x583   :  { %p4209_p7 = pnand %p4207_p6, %p4204_p5 }
 0x585   :  { %4212 = shalt.err (!%p4209_p7)
}
 0x586   :  { %3447 = dma.vmem_to_hbm [thread:$0]  %s3442_s11, 1024, %s4679_s12, [#allocation4], %s4236_s5, %s4236_s5, %s4237_s22  }
 0x587   :  { %4221 = dma.done.wait [#allocation4], 1024  }
 0x588   :  { %4222 = vsyncadd [#allocation4], 4294966272 }
 0x589   :  { %3451 = vsyncpa [#allocation3], 1 }
 0x58a   :  { %3452 = vsyncpa [#allocation6], 1 }
 0x58b   :  { %3453 = vsyncpa [#allocation9], 1 }
 0x58c   :  { %3454 = vsyncpa [#allocation12], 1 }
 0x58d   :  { %3455 = vsyncpa [#allocation4], 1 }

</bundles_post_ra>
